<compile_context>
chip_gen: v6e
topology: v6e:2x2x1
jax: 0.10.0
libtpu: 0.0.40
codegen_flags: <defaults>
</compile_context>

<pallas_src>
import functools

import jax
import jax.numpy as jnp
from jax import lax
from jax.experimental import pallas as pl
from jax.experimental.pallas import tpu as pltpu

_C = 8        # out_chans of every conv
_GROUPS = 4   # GroupNorm groups
_EPS = 1e-5   # GroupNorm eps (PyTorch default)
_LANE = 128


def _gelu(x):
    # TODO(synk): nn.GELU() defaults to the exact erf form; kernel and in-script reference
    # both use the tanh approximation (max abs deviation ~1e-3) to guarantee Mosaic lowering.
    return 0.5 * x * (1.0 + jnp.tanh(0.7978845608028654 * (x + 0.044715 * x * x * x)))


def _temporal_conv_kernel(x_ref, w_ref, p_ref, m_ref, o_ref, *, inv_n):
    """Fused conv1 -> GN -> GELU -> conv2 -> GN -> GELU -> conv3 -> GN -> GELU.

    x_ref: (Bt, 8, Mp)  phase-major input (row r = x[:, 8t+r], flattened p = na*T1 + t)
    w_ref: (9, 8, 8)    [W1a, W1b, W2m, W20, W2p, W3m, W30, W3p, P(group pair-sum)]
    p_ref: (8, 9)       per-channel columns [b1,g1,be1,b2,g2,be2,b3,g3,be3]
    m_ref: (3, Mp)      f32 masks [valid (p<M), prev-ok (t>0 & valid), next-ok (t<T1-1 & valid)]
    o_ref: (Bt, 8, Mp)  channel-major output slab
    """
    bt = x_ref.shape[0]
    mp = x_ref.shape[2]

    # Loop invariants, hoisted once per grid step (shared by all Bt samples).
    valid = m_ref[0:1, :]
    ok_prev = m_ref[1:2, :]
    ok_next = m_ref[2:3, :]

    w1a, w1b = w_ref[0], w_ref[1]
    w2m, w20, w2p = w_ref[2], w_ref[3], w_ref[4]
    w3m, w30, w3p = w_ref[5], w_ref[6], w_ref[7]
    pair = w_ref[8]
    b1, g1, be1 = p_ref[:, 0:1], p_ref[:, 1:2], p_ref[:, 2:3]
    b2, g2, be2 = p_ref[:, 3:4], p_ref[:, 4:5], p_ref[:, 5:6]
    b3, g3, be3 = p_ref[:, 6:7], p_ref[:, 7:8], p_ref[:, 8:9]

    def dotf(a, b):
        # All channel/tap mixing on the MXU, true-f32 precision.
        return jnp.dot(a, b, preferred_element_type=jnp.float32,
                       precision=lax.Precision.HIGHEST)

    def tap_prev(h):   # h at (na, t-1); zero at t == 0 and in the lane-pad region
        return pltpu.roll(h, 1, axis=1) * ok_prev

    def tap_next(h):   # h at (na, t+1); zero at t == T1-1 and in the lane-pad region
        return pltpu.roll(h, mp - 1, axis=1) * ok_next

    def gn_gelu(y, gamma, beta):
        # y is exactly zero in the lane-pad region, so plain slab sums are valid-data sums.
        s1 = jnp.sum(y, axis=1, keepdims=True)         # (8,1) per-channel sum
        s2 = jnp.sum(y * y, axis=1, keepdims=True)     # (8,1) per-channel sum of squares
        mean = dotf(pair, s1) * inv_n                  # (8,1) per-group mean, per channel
        ex2 = dotf(pair, s2) * inv_n                   # (8,1) per-group E[x^2]
        scale = lax.rsqrt(ex2 - mean * mean + _EPS) * gamma
        shift = beta - mean * scale
        return _gelu(y * scale + shift)

    def process(b):
        x = x_ref[b].astype(jnp.float32)                                        # (8, Mp)
        # conv1 (kernel 15, stride 8, pad 7) via the 8-phase decomposition.
        h = (dotf(w1a, x) + dotf(w1b, tap_prev(x)) + b1) * valid
        h = gn_gelu(h, g1, be1)
        # conv2 (kernel 3, pad 1).
        h = (dotf(w2m, tap_prev(h)) + dotf(w20, h) + dotf(w2p, tap_next(h)) + b2) * valid
        h = gn_gelu(h, g2, be2)
        # conv3 (kernel 3, pad 1).
        h = (dotf(w3m, tap_prev(h)) + dotf(w30, h) + dotf(w3p, tap_next(h)) + b3) * valid
        h = gn_gelu(h, g3, be3)
        o_ref[b] = h.astype(o_ref.dtype)

    if bt == 1:
        process(0)
    else:
        @pl.loop(0, bt)
        def _(b):
            process(b)


def _largest_divisor_le(n, cap):
    for d in range(min(n, cap), 0, -1):
        if n % d == 0:
            return d
    return 1


@jax.jit
def temporal_conv(x, w1, b1, g1, be1, w2, b2, g2, be2, w3, b3, g3, be3):
    """TemporalConv.forward.  x: (B, N, A, T) -> (B, N*A, (T//8)*8)."""
    B, N, A, T = x.shape
    NA = N * A
    if T % 8 != 0:
        raise ValueError(f"T ({T}) must be divisible by the conv1 stride (8).")
    T1 = T // 8
    M = NA * T1
    Mp = ((M + _LANE - 1) // _LANE) * _LANE

    # Input: phase deinterleave + flatten (na,t) + pad lanes to a multiple of 128.
    # (single XLA relayout pass; xph[b, r, na*T1 + t] = x[b, na, 8t + r])
    xph = x.reshape(B, NA, T1, 8).transpose(0, 3, 1, 2).reshape(B, _C, M)
    if Mp != M:
        xph = jnp.pad(xph, ((0, 0), (0, 0), (0, Mp - M)))

    # Weights: conv taps as (8,8) channel-mixing matrices + GroupNorm pair-sum matrix.
    w1_2d = w1.reshape(_C, 15).astype(jnp.float32)
    w1a = w1_2d[:, 7:15]                                              # taps aligned with t
    w1b = jnp.concatenate(
        [jnp.zeros((_C, 1), jnp.float32), w1_2d[:, 0:7]], axis=1)     # taps aligned with t-1
    w2_3 = w2.reshape(_C, _C, 3).astype(jnp.float32)
    w3_3 = w3.reshape(_C, _C, 3).astype(jnp.float32)
    pair = jnp.kron(jnp.eye(_GROUPS, dtype=jnp.float32),
                    jnp.ones((2, 2), jnp.float32))                    # group pair-sum (8,8)
    wstk = jnp.stack([w1a, w1b,
                      w2_3[:, :, 0], w2_3[:, :, 1], w2_3[:, :, 2],
                      w3_3[:, :, 0], w3_3[:, :, 1], w3_3[:, :, 2],
                      pair], axis=0)                                  # (9, 8, 8)
    params = jnp.stack([b1, g1, be1, b2, g2, be2, b3, g3, be3],
                       axis=1).astype(jnp.float32)                    # (8, 9)

    # Masks: lane-pad validity and t==0 / t==T1-1 boundaries (host-precomputed).
    pos = jnp.arange(Mp, dtype=jnp.int32)
    t_in = pos % T1
    valid = pos < M
    masks = jnp.stack([valid,
                       valid & (t_in != 0),
                       valid & (t_in != T1 - 1)], axis=0).astype(jnp.float32)  # (3, Mp)

    # Block size: Bt samples per grid step (amortize step overhead, keep VMEM small).
    per_sample = 2 * _C * Mp * 4                                   # in + out slab bytes (f32)
    bt_cap = max(1, min(8, (8 * 1024 * 1024) // (2 * per_sample)))  # x2 for double-buffering
    Bt = _largest_divisor_le(B, int(bt_cap))
    if (B // Bt) % 2 == 1 and Bt % 2 == 0:
        Bt //= 2                                 # keep parallel extent even for v7x's 2 TCs

    kernel = functools.partial(_temporal_conv_kernel, inv_n=1.0 / float(2 * M))
    out_planes = pl.pallas_call(
        kernel,
        out_shape=jax.ShapeDtypeStruct((B, _C, Mp), jnp.float32),
        grid=(B // Bt,),
        in_specs=[
            pl.BlockSpec((Bt, _C, Mp), lambda i: (i, 0, 0)),
            pl.BlockSpec((9, _C, _C), lambda i: (0, 0, 0)),
            pl.BlockSpec((_C, 9), lambda i: (0, 0)),
            pl.BlockSpec((3, Mp), lambda i: (0, 0)),
        ],
        out_specs=pl.BlockSpec((Bt, _C, Mp), lambda i: (i, 0, 0)),
        compiler_params=pltpu.CompilerParams(
            dimension_semantics=("parallel",),
            vmem_limit_bytes=32 * 1024 * 1024,
        ),
    )(xph, wstk, params, masks)

    # Output: drop lane padding and interleave 'B C NA T -> B NA (T C)' (XLA pass).
    out = out_planes[:, :, :M].reshape(B, _C, NA, T1).transpose(0, 2, 3, 1)
    return out.reshape(B, NA, T1 * _C).astype(x.dtype)


def temporal_conv_reference(x, w1, b1, g1, be1, w2, b2, g2, be2, w3, b3, g3, be3):
    """Pure-JAX reference (XLA convs, f32 precision) matching the PyTorch forward (tanh GELU)."""
    B, N, A, T = x.shape
    NA = N * A
    h = x.reshape(B, NA, T)[:, None, :, :]  # (B, 1, NA, T)

    def conv(h, w, b, stride_w, pad_w):
        out = lax.conv_general_dilated(
            h, w, window_strides=(1, stride_w),
            padding=((0, 0), (pad_w, pad_w)),
            dimension_numbers=("NCHW", "OIHW", "NCHW"),
            precision=lax.Precision.HIGHEST)
        return out + b[None, :, None, None]

    def gn(h, gamma, beta):
        Bc, Cc, Hc, Wc = h.shape
        hg = h.reshape(Bc, _GROUPS, -1)
        mean = hg.mean(axis=-1, keepdims=True)
        var = hg.var(axis=-1, keepdims=True)
        hn = ((hg - mean) / jnp.sqrt(var + _EPS)).reshape(Bc, Cc, Hc, Wc)
        return hn * gamma[None, :, None, None] + beta[None, :, None, None]

    h = _gelu(gn(conv(h, w1, b1, 8, 7), g1, be1))
    h = _gelu(gn(conv(h, w2, b2, 1, 1), g2, be2))
    h = _gelu(gn(conv(h, w3, b3, 1, 1), g3, be3))
    Bc, Cc, NAc, T1c = h.shape
    return h.transpose(0, 2, 3, 1).reshape(Bc, NAc, T1c * Cc)


if __name__ == "__main__":
    # Small shapes consistent with the forward: x is (B, N, A, T), T divisible by 8.
    # NA*T1 = 150 is deliberately NOT a multiple of 128 so the lane-pad/mask path is exercised.
    B, N, A, T = 4, 2, 5, 120
    key = jax.random.PRNGKey(0)
    ks = jax.random.split(key, 13)

    x = jax.random.normal(ks[0], (B, N, A, T), dtype=jnp.float32)
    # Conv / GroupNorm parameters in PyTorch layouts.
    w1 = jax.random.normal(ks[1], (_C, 1, 1, 15), jnp.float32) * 0.1
    b1 = jax.random.normal(ks[2], (_C,), jnp.float32) * 0.1
    g1 = 1.0 + 0.1 * jax.random.normal(ks[3], (_C,), jnp.float32)
    be1 = 0.1 * jax.random.normal(ks[4], (_C,), jnp.float32)
    w2 = jax.random.normal(ks[5], (_C, _C, 1, 3), jnp.float32) * 0.1
    b2 = jax.random.normal(ks[6], (_C,), jnp.float32) * 0.1
    g2 = 1.0 + 0.1 * jax.random.normal(ks[7], (_C,), jnp.float32)
    be2 = 0.1 * jax.random.normal(ks[8], (_C,), jnp.float32)
    w3 = jax.random.normal(ks[9], (_C, _C, 1, 3), jnp.float32) * 0.1
    b3 = jax.random.normal(ks[10], (_C,), jnp.float32) * 0.1
    g3 = 1.0 + 0.1 * jax.random.normal(ks[11], (_C,), jnp.float32)
    be3 = 0.1 * jax.random.normal(ks[12], (_C,), jnp.float32)

    args = (x, w1, b1, g1, be1, w2, b2, g2, be2, w3, b3, g3, be3)
    out = jax.block_until_ready(temporal_conv(*args))
    ref = jax.block_until_ready(temporal_conv_reference(*args))

    assert out.shape == (B, N * A, (T // 8) * _C), out.shape
    max_err = float(jnp.max(jnp.abs(out - ref)))
    assert max_err < 5e-4, f"max abs err = {max_err}"

    print("KERNEL_OK")
</pallas_src>

<mosaic_0001>
module attributes {stable_mosaic.version = 11 : i64} {
  func.func @_temporal_conv_kernel(%arg0: i32, %arg1: memref<2x8x256xf32, #tpu.memory_space<vmem>>, %arg2: memref<9x8x8xf32, #tpu.memory_space<vmem>>, %arg3: memref<8x9xf32, #tpu.memory_space<vmem>>, %arg4: memref<3x256xf32, #tpu.memory_space<vmem>>, %arg5: memref<2x8x256xf32, #tpu.memory_space<vmem>>) attributes {dimension_semantics = [#tpu.dimension_semantics<parallel>], iteration_bounds = array<i64: 2>, scalar_prefetch = 0 : i64, scratch_operands = 0 : i64, tpu.core_type = #tpu.core_type<tc>, window_params = [{transform_indices = @transform_0, window_bounds = array<i64: 2, 8, 256>}, {pipeline_mode = #tpu.pipeline_mode<synchronous>, transform_indices = @transform_1, window_bounds = array<i64: 9, 8, 8>}, {pipeline_mode = #tpu.pipeline_mode<synchronous>, transform_indices = @transform_2, window_bounds = array<i64: 8, 9>}, {pipeline_mode = #tpu.pipeline_mode<synchronous>, transform_indices = @transform_3, window_bounds = array<i64: 3, 256>}, {transform_indices = @transform_4, window_bounds = array<i64: 2, 8, 256>}]} {
    %c0 = arith.constant 0 : index
    %c0_0 = arith.constant 0 : index
    %0 = vector.load %arg4[%c0, %c0_0] : memref<3x256xf32, #tpu.memory_space<vmem>>, vector<1x256xf32>
    %c1 = arith.constant 1 : index
    %c0_1 = arith.constant 0 : index
    %1 = vector.load %arg4[%c1, %c0_1] : memref<3x256xf32, #tpu.memory_space<vmem>>, vector<1x256xf32>
    %c2 = arith.constant 2 : index
    %c0_2 = arith.constant 0 : index
    %2 = vector.load %arg4[%c2, %c0_2] : memref<3x256xf32, #tpu.memory_space<vmem>>, vector<1x256xf32>
    %c0_3 = arith.constant 0 : index
    %c0_4 = arith.constant 0 : index
    %c0_5 = arith.constant 0 : index
    %3 = vector.load %arg2[%c0_3, %c0_4, %c0_5] : memref<9x8x8xf32, #tpu.memory_space<vmem>>, vector<1x8x8xf32>
    %4 = vector.shape_cast %3 : vector<1x8x8xf32> to vector<8x8xf32>
    %c1_6 = arith.constant 1 : index
    %c0_7 = arith.constant 0 : index
    %c0_8 = arith.constant 0 : index
    %5 = vector.load %arg2[%c1_6, %c0_7, %c0_8] : memref<9x8x8xf32, #tpu.memory_space<vmem>>, vector<1x8x8xf32>
    %6 = vector.shape_cast %5 : vector<1x8x8xf32> to vector<8x8xf32>
    %c2_9 = arith.constant 2 : index
    %c0_10 = arith.constant 0 : index
    %c0_11 = arith.constant 0 : index
    %7 = vector.load %arg2[%c2_9, %c0_10, %c0_11] : memref<9x8x8xf32, #tpu.memory_space<vmem>>, vector<1x8x8xf32>
    %8 = vector.shape_cast %7 : vector<1x8x8xf32> to vector<8x8xf32>
    %c3 = arith.constant 3 : index
    %c0_12 = arith.constant 0 : index
    %c0_13 = arith.constant 0 : index
    %9 = vector.load %arg2[%c3, %c0_12, %c0_13] : memref<9x8x8xf32, #tpu.memory_space<vmem>>, vector<1x8x8xf32>
    %10 = vector.shape_cast %9 : vector<1x8x8xf32> to vector<8x8xf32>
    %c4 = arith.constant 4 : index
    %c0_14 = arith.constant 0 : index
    %c0_15 = arith.constant 0 : index
    %11 = vector.load %arg2[%c4, %c0_14, %c0_15] : memref<9x8x8xf32, #tpu.memory_space<vmem>>, vector<1x8x8xf32>
    %12 = vector.shape_cast %11 : vector<1x8x8xf32> to vector<8x8xf32>
    %c5 = arith.constant 5 : index
    %c0_16 = arith.constant 0 : index
    %c0_17 = arith.constant 0 : index
    %13 = vector.load %arg2[%c5, %c0_16, %c0_17] : memref<9x8x8xf32, #tpu.memory_space<vmem>>, vector<1x8x8xf32>
    %14 = vector.shape_cast %13 : vector<1x8x8xf32> to vector<8x8xf32>
    %c6 = arith.constant 6 : index
    %c0_18 = arith.constant 0 : index
    %c0_19 = arith.constant 0 : index
    %15 = vector.load %arg2[%c6, %c0_18, %c0_19] : memref<9x8x8xf32, #tpu.memory_space<vmem>>, vector<1x8x8xf32>
    %16 = vector.shape_cast %15 : vector<1x8x8xf32> to vector<8x8xf32>
    %c7 = arith.constant 7 : index
    %c0_20 = arith.constant 0 : index
    %c0_21 = arith.constant 0 : index
    %17 = vector.load %arg2[%c7, %c0_20, %c0_21] : memref<9x8x8xf32, #tpu.memory_space<vmem>>, vector<1x8x8xf32>
    %18 = vector.shape_cast %17 : vector<1x8x8xf32> to vector<8x8xf32>
    %c8 = arith.constant 8 : index
    %c0_22 = arith.constant 0 : index
    %c0_23 = arith.constant 0 : index
    %19 = vector.load %arg2[%c8, %c0_22, %c0_23] : memref<9x8x8xf32, #tpu.memory_space<vmem>>, vector<1x8x8xf32>
    %20 = vector.shape_cast %19 : vector<1x8x8xf32> to vector<8x8xf32>
    %c0_24 = arith.constant 0 : index
    %c0_25 = arith.constant 0 : index
    %21 = vector.load %arg3[%c0_24, %c0_25] : memref<8x9xf32, #tpu.memory_space<vmem>>, vector<8x1xf32>
    %c0_26 = arith.constant 0 : index
    %c1_27 = arith.constant 1 : index
    %22 = vector.load %arg3[%c0_26, %c1_27] : memref<8x9xf32, #tpu.memory_space<vmem>>, vector<8x1xf32>
    %c0_28 = arith.constant 0 : index
    %c2_29 = arith.constant 2 : index
    %23 = vector.load %arg3[%c0_28, %c2_29] : memref<8x9xf32, #tpu.memory_space<vmem>>, vector<8x1xf32>
    %c0_30 = arith.constant 0 : index
    %c3_31 = arith.constant 3 : index
    %24 = vector.load %arg3[%c0_30, %c3_31] : memref<8x9xf32, #tpu.memory_space<vmem>>, vector<8x1xf32>
    %c0_32 = arith.constant 0 : index
    %c4_33 = arith.constant 4 : index
    %25 = vector.load %arg3[%c0_32, %c4_33] : memref<8x9xf32, #tpu.memory_space<vmem>>, vector<8x1xf32>
    %c0_34 = arith.constant 0 : index
    %c5_35 = arith.constant 5 : index
    %26 = vector.load %arg3[%c0_34, %c5_35] : memref<8x9xf32, #tpu.memory_space<vmem>>, vector<8x1xf32>
    %c0_36 = arith.constant 0 : index
    %c6_37 = arith.constant 6 : index
    %27 = vector.load %arg3[%c0_36, %c6_37] : memref<8x9xf32, #tpu.memory_space<vmem>>, vector<8x1xf32>
    %c0_38 = arith.constant 0 : index
    %c7_39 = arith.constant 7 : index
    %28 = vector.load %arg3[%c0_38, %c7_39] : memref<8x9xf32, #tpu.memory_space<vmem>>, vector<8x1xf32>
    %c0_40 = arith.constant 0 : index
    %c8_41 = arith.constant 8 : index
    %29 = vector.load %arg3[%c0_40, %c8_41] : memref<8x9xf32, #tpu.memory_space<vmem>>, vector<8x1xf32>
    %c0_i32 = arith.constant 0 : i32
    %c2_i32 = arith.constant 2 : i32
    %30 = arith.addi %c0_i32, %c2_i32 : i32
    %c1_i32 = arith.constant 1 : i32
    scf.for %arg6 = %c0_i32 to %30 step %c1_i32  : i32 {
      %c1_i32_43 = arith.constant 1 : i32
      %31 = arith.muli %arg6, %c1_i32_43 : i32
      %c0_i32_44 = arith.constant 0 : i32
      %32 = arith.addi %c0_i32_44, %31 : i32
      %33 = arith.index_cast %32 : i32 to index
      %c0_45 = arith.constant 0 : index
      %c0_46 = arith.constant 0 : index
      %34 = vector.load %arg1[%33, %c0_45, %c0_46] : memref<2x8x256xf32, #tpu.memory_space<vmem>>, vector<1x8x256xf32>
      %35 = vector.shape_cast %34 : vector<1x8x256xf32> to vector<8x256xf32>
      %cst = arith.constant dense<0.000000e+00> : vector<8x256xf32>
      %36 = tpu.matmul %4, %35, %cst {dimension_numbers = #tpu.dot_dimension_numbers<[1], [0], [0], [1], [0, 0, 1, 1], [], []>, precision = #tpu.contract_precision<fp32>} : vector<8x8xf32>, vector<8x256xf32>, vector<8x256xf32> -> vector<8x256xf32>
      %c1_i32_47 = arith.constant 1 : i32
      %37 = tpu.dynamic_rotate %35 by %c1_i32_47 dim 1 : vector<8x256xf32>, i32 -> vector<8x256xf32>
      %38 = vector.broadcast %1 : vector<1x256xf32> to vector<8x256xf32>
      %39 = arith.mulf %37, %38 : vector<8x256xf32>
      %cst_48 = arith.constant dense<0.000000e+00> : vector<8x256xf32>
      %40 = tpu.matmul %6, %39, %cst_48 {dimension_numbers = #tpu.dot_dimension_numbers<[1], [0], [0], [1], [0, 0, 1, 1], [], []>, precision = #tpu.contract_precision<fp32>} : vector<8x8xf32>, vector<8x256xf32>, vector<8x256xf32> -> vector<8x256xf32>
      %41 = arith.addf %36, %40 : vector<8x256xf32>
      %42 = vector.broadcast %21 : vector<8x1xf32> to vector<8x256xf32>
      %43 = arith.addf %41, %42 : vector<8x256xf32>
      %44 = vector.broadcast %0 : vector<1x256xf32> to vector<8x256xf32>
      %45 = arith.mulf %43, %44 : vector<8x256xf32>
      %cst_49 = arith.constant dense<0.000000e+00> : vector<8xf32>
      %46 = vector.multi_reduction <add>, %45, %cst_49 [1] : vector<8x256xf32> to vector<8xf32>
      %47 = vector.shape_cast %46 : vector<8xf32> to vector<8x1xf32>
      %48 = arith.mulf %45, %45 : vector<8x256xf32>
      %cst_50 = arith.constant dense<0.000000e+00> : vector<8xf32>
      %49 = vector.multi_reduction <add>, %48, %cst_50 [1] : vector<8x256xf32> to vector<8xf32>
      %50 = vector.shape_cast %49 : vector<8xf32> to vector<8x1xf32>
      %cst_51 = arith.constant dense<0.000000e+00> : vector<8x1xf32>
      %51 = tpu.matmul %20, %47, %cst_51 {dimension_numbers = #tpu.dot_dimension_numbers<[1], [0], [0], [1], [0, 0, 1, 1], [], []>, precision = #tpu.contract_precision<fp32>} : vector<8x8xf32>, vector<8x1xf32>, vector<8x1xf32> -> vector<8x1xf32>
      %cst_52 = arith.constant 0.00333333341 : f32
      %52 = vector.broadcast %cst_52 : f32 to vector<8x1xf32>
      %53 = arith.mulf %51, %52 : vector<8x1xf32>
      %cst_53 = arith.constant dense<0.000000e+00> : vector<8x1xf32>
      %54 = tpu.matmul %20, %50, %cst_53 {dimension_numbers = #tpu.dot_dimension_numbers<[1], [0], [0], [1], [0, 0, 1, 1], [], []>, precision = #tpu.contract_precision<fp32>} : vector<8x8xf32>, vector<8x1xf32>, vector<8x1xf32> -> vector<8x1xf32>
      %cst_54 = arith.constant 0.00333333341 : f32
      %55 = vector.broadcast %cst_54 : f32 to vector<8x1xf32>
      %56 = arith.mulf %54, %55 : vector<8x1xf32>
      %57 = arith.mulf %53, %53 : vector<8x1xf32>
      %58 = arith.subf %56, %57 : vector<8x1xf32>
      %cst_55 = arith.constant 9.99999974E-6 : f32
      %59 = vector.broadcast %cst_55 : f32 to vector<8x1xf32>
      %60 = arith.addf %58, %59 : vector<8x1xf32>
      %61 = math.rsqrt %60 : vector<8x1xf32>
      %62 = arith.mulf %61, %22 : vector<8x1xf32>
      %63 = arith.mulf %53, %62 : vector<8x1xf32>
      %64 = arith.subf %23, %63 : vector<8x1xf32>
      %65 = vector.broadcast %62 : vector<8x1xf32> to vector<8x256xf32>
      %66 = arith.mulf %45, %65 : vector<8x256xf32>
      %67 = vector.broadcast %64 : vector<8x1xf32> to vector<8x256xf32>
      %68 = arith.addf %66, %67 : vector<8x256xf32>
      %cst_56 = arith.constant 5.000000e-01 : f32
      %69 = vector.broadcast %cst_56 : f32 to vector<8x256xf32>
      %70 = arith.mulf %69, %68 : vector<8x256xf32>
      %cst_57 = arith.constant 4.471500e-02 : f32
      %71 = vector.broadcast %cst_57 : f32 to vector<8x256xf32>
      %72 = arith.mulf %71, %68 : vector<8x256xf32>
      %73 = arith.mulf %72, %68 : vector<8x256xf32>
      %74 = arith.mulf %73, %68 : vector<8x256xf32>
      %75 = arith.addf %68, %74 : vector<8x256xf32>
      %cst_58 = arith.constant 0.797884583 : f32
      %76 = vector.broadcast %cst_58 : f32 to vector<8x256xf32>
      %77 = arith.mulf %76, %75 : vector<8x256xf32>
      %78 = math.tanh %77 : vector<8x256xf32>
      %cst_59 = arith.constant 1.000000e+00 : f32
      %79 = vector.broadcast %cst_59 : f32 to vector<8x256xf32>
      %80 = arith.addf %79, %78 : vector<8x256xf32>
      %81 = arith.mulf %70, %80 : vector<8x256xf32>
      %c1_i32_60 = arith.constant 1 : i32
      %82 = tpu.dynamic_rotate %81 by %c1_i32_60 dim 1 : vector<8x256xf32>, i32 -> vector<8x256xf32>
      %83 = vector.broadcast %1 : vector<1x256xf32> to vector<8x256xf32>
      %84 = arith.mulf %82, %83 : vector<8x256xf32>
      %cst_61 = arith.constant dense<0.000000e+00> : vector<8x256xf32>
      %85 = tpu.matmul %8, %84, %cst_61 {dimension_numbers = #tpu.dot_dimension_numbers<[1], [0], [0], [1], [0, 0, 1, 1], [], []>, precision = #tpu.contract_precision<fp32>} : vector<8x8xf32>, vector<8x256xf32>, vector<8x256xf32> -> vector<8x256xf32>
      %cst_62 = arith.constant dense<0.000000e+00> : vector<8x256xf32>
      %86 = tpu.matmul %10, %81, %cst_62 {dimension_numbers = #tpu.dot_dimension_numbers<[1], [0], [0], [1], [0, 0, 1, 1], [], []>, precision = #tpu.contract_precision<fp32>} : vector<8x8xf32>, vector<8x256xf32>, vector<8x256xf32> -> vector<8x256xf32>
      %87 = arith.addf %85, %86 : vector<8x256xf32>
      %c255_i32 = arith.constant 255 : i32
      %88 = tpu.dynamic_rotate %81 by %c255_i32 dim 1 : vector<8x256xf32>, i32 -> vector<8x256xf32>
      %89 = vector.broadcast %2 : vector<1x256xf32> to vector<8x256xf32>
      %90 = arith.mulf %88, %89 : vector<8x256xf32>
      %cst_63 = arith.constant dense<0.000000e+00> : vector<8x256xf32>
      %91 = tpu.matmul %12, %90, %cst_63 {dimension_numbers = #tpu.dot_dimension_numbers<[1], [0], [0], [1], [0, 0, 1, 1], [], []>, precision = #tpu.contract_precision<fp32>} : vector<8x8xf32>, vector<8x256xf32>, vector<8x256xf32> -> vector<8x256xf32>
      %92 = arith.addf %87, %91 : vector<8x256xf32>
      %93 = vector.broadcast %24 : vector<8x1xf32> to vector<8x256xf32>
      %94 = arith.addf %92, %93 : vector<8x256xf32>
      %95 = vector.broadcast %0 : vector<1x256xf32> to vector<8x256xf32>
      %96 = arith.mulf %94, %95 : vector<8x256xf32>
      %cst_64 = arith.constant dense<0.000000e+00> : vector<8xf32>
      %97 = vector.multi_reduction <add>, %96, %cst_64 [1] : vector<8x256xf32> to vector<8xf32>
      %98 = vector.shape_cast %97 : vector<8xf32> to vector<8x1xf32>
      %99 = arith.mulf %96, %96 : vector<8x256xf32>
      %cst_65 = arith.constant dense<0.000000e+00> : vector<8xf32>
      %100 = vector.multi_reduction <add>, %99, %cst_65 [1] : vector<8x256xf32> to vector<8xf32>
      %101 = vector.shape_cast %100 : vector<8xf32> to vector<8x1xf32>
      %cst_66 = arith.constant dense<0.000000e+00> : vector<8x1xf32>
      %102 = tpu.matmul %20, %98, %cst_66 {dimension_numbers = #tpu.dot_dimension_numbers<[1], [0], [0], [1], [0, 0, 1, 1], [], []>, precision = #tpu.contract_precision<fp32>} : vector<8x8xf32>, vector<8x1xf32>, vector<8x1xf32> -> vector<8x1xf32>
      %cst_67 = arith.constant 0.00333333341 : f32
      %103 = vector.broadcast %cst_67 : f32 to vector<8x1xf32>
      %104 = arith.mulf %102, %103 : vector<8x1xf32>
      %cst_68 = arith.constant dense<0.000000e+00> : vector<8x1xf32>
      %105 = tpu.matmul %20, %101, %cst_68 {dimension_numbers = #tpu.dot_dimension_numbers<[1], [0], [0], [1], [0, 0, 1, 1], [], []>, precision = #tpu.contract_precision<fp32>} : vector<8x8xf32>, vector<8x1xf32>, vector<8x1xf32> -> vector<8x1xf32>
      %cst_69 = arith.constant 0.00333333341 : f32
      %106 = vector.broadcast %cst_69 : f32 to vector<8x1xf32>
      %107 = arith.mulf %105, %106 : vector<8x1xf32>
      %108 = arith.mulf %104, %104 : vector<8x1xf32>
      %109 = arith.subf %107, %108 : vector<8x1xf32>
      %cst_70 = arith.constant 9.99999974E-6 : f32
      %110 = vector.broadcast %cst_70 : f32 to vector<8x1xf32>
      %111 = arith.addf %109, %110 : vector<8x1xf32>
      %112 = math.rsqrt %111 : vector<8x1xf32>
      %113 = arith.mulf %112, %25 : vector<8x1xf32>
      %114 = arith.mulf %104, %113 : vector<8x1xf32>
      %115 = arith.subf %26, %114 : vector<8x1xf32>
      %116 = vector.broadcast %113 : vector<8x1xf32> to vector<8x256xf32>
      %117 = arith.mulf %96, %116 : vector<8x256xf32>
      %118 = vector.broadcast %115 : vector<8x1xf32> to vector<8x256xf32>
      %119 = arith.addf %117, %118 : vector<8x256xf32>
      %cst_71 = arith.constant 5.000000e-01 : f32
      %120 = vector.broadcast %cst_71 : f32 to vector<8x256xf32>
      %121 = arith.mulf %120, %119 : vector<8x256xf32>
      %cst_72 = arith.constant 4.471500e-02 : f32
      %122 = vector.broadcast %cst_72 : f32 to vector<8x256xf32>
      %123 = arith.mulf %122, %119 : vector<8x256xf32>
      %124 = arith.mulf %123, %119 : vector<8x256xf32>
      %125 = arith.mulf %124, %119 : vector<8x256xf32>
      %126 = arith.addf %119, %125 : vector<8x256xf32>
      %cst_73 = arith.constant 0.797884583 : f32
      %127 = vector.broadcast %cst_73 : f32 to vector<8x256xf32>
      %128 = arith.mulf %127, %126 : vector<8x256xf32>
      %129 = math.tanh %128 : vector<8x256xf32>
      %cst_74 = arith.constant 1.000000e+00 : f32
      %130 = vector.broadcast %cst_74 : f32 to vector<8x256xf32>
      %131 = arith.addf %130, %129 : vector<8x256xf32>
      %132 = arith.mulf %121, %131 : vector<8x256xf32>
      %c1_i32_75 = arith.constant 1 : i32
      %133 = tpu.dynamic_rotate %132 by %c1_i32_75 dim 1 : vector<8x256xf32>, i32 -> vector<8x256xf32>
      %134 = vector.broadcast %1 : vector<1x256xf32> to vector<8x256xf32>
      %135 = arith.mulf %133, %134 : vector<8x256xf32>
      %cst_76 = arith.constant dense<0.000000e+00> : vector<8x256xf32>
      %136 = tpu.matmul %14, %135, %cst_76 {dimension_numbers = #tpu.dot_dimension_numbers<[1], [0], [0], [1], [0, 0, 1, 1], [], []>, precision = #tpu.contract_precision<fp32>} : vector<8x8xf32>, vector<8x256xf32>, vector<8x256xf32> -> vector<8x256xf32>
      %cst_77 = arith.constant dense<0.000000e+00> : vector<8x256xf32>
      %137 = tpu.matmul %16, %132, %cst_77 {dimension_numbers = #tpu.dot_dimension_numbers<[1], [0], [0], [1], [0, 0, 1, 1], [], []>, precision = #tpu.contract_precision<fp32>} : vector<8x8xf32>, vector<8x256xf32>, vector<8x256xf32> -> vector<8x256xf32>
      %138 = arith.addf %136, %137 : vector<8x256xf32>
      %c255_i32_78 = arith.constant 255 : i32
      %139 = tpu.dynamic_rotate %132 by %c255_i32_78 dim 1 : vector<8x256xf32>, i32 -> vector<8x256xf32>
      %140 = vector.broadcast %2 : vector<1x256xf32> to vector<8x256xf32>
      %141 = arith.mulf %139, %140 : vector<8x256xf32>
      %cst_79 = arith.constant dense<0.000000e+00> : vector<8x256xf32>
      %142 = tpu.matmul %18, %141, %cst_79 {dimension_numbers = #tpu.dot_dimension_numbers<[1], [0], [0], [1], [0, 0, 1, 1], [], []>, precision = #tpu.contract_precision<fp32>} : vector<8x8xf32>, vector<8x256xf32>, vector<8x256xf32> -> vector<8x256xf32>
      %143 = arith.addf %138, %142 : vector<8x256xf32>
      %144 = vector.broadcast %27 : vector<8x1xf32> to vector<8x256xf32>
      %145 = arith.addf %143, %144 : vector<8x256xf32>
      %146 = vector.broadcast %0 : vector<1x256xf32> to vector<8x256xf32>
      %147 = arith.mulf %145, %146 : vector<8x256xf32>
      %cst_80 = arith.constant dense<0.000000e+00> : vector<8xf32>
      %148 = vector.multi_reduction <add>, %147, %cst_80 [1] : vector<8x256xf32> to vector<8xf32>
      %149 = vector.shape_cast %148 : vector<8xf32> to vector<8x1xf32>
      %150 = arith.mulf %147, %147 : vector<8x256xf32>
      %cst_81 = arith.constant dense<0.000000e+00> : vector<8xf32>
      %151 = vector.multi_reduction <add>, %150, %cst_81 [1] : vector<8x256xf32> to vector<8xf32>
      %152 = vector.shape_cast %151 : vector<8xf32> to vector<8x1xf32>
      %cst_82 = arith.constant dense<0.000000e+00> : vector<8x1xf32>
      %153 = tpu.matmul %20, %149, %cst_82 {dimension_numbers = #tpu.dot_dimension_numbers<[1], [0], [0], [1], [0, 0, 1, 1], [], []>, precision = #tpu.contract_precision<fp32>} : vector<8x8xf32>, vector<8x1xf32>, vector<8x1xf32> -> vector<8x1xf32>
      %cst_83 = arith.constant 0.00333333341 : f32
      %154 = vector.broadcast %cst_83 : f32 to vector<8x1xf32>
      %155 = arith.mulf %153, %154 : vector<8x1xf32>
      %cst_84 = arith.constant dense<0.000000e+00> : vector<8x1xf32>
      %156 = tpu.matmul %20, %152, %cst_84 {dimension_numbers = #tpu.dot_dimension_numbers<[1], [0], [0], [1], [0, 0, 1, 1], [], []>, precision = #tpu.contract_precision<fp32>} : vector<8x8xf32>, vector<8x1xf32>, vector<8x1xf32> -> vector<8x1xf32>
      %cst_85 = arith.constant 0.00333333341 : f32
      %157 = vector.broadcast %cst_85 : f32 to vector<8x1xf32>
      %158 = arith.mulf %156, %157 : vector<8x1xf32>
      %159 = arith.mulf %155, %155 : vector<8x1xf32>
      %160 = arith.subf %158, %159 : vector<8x1xf32>
      %cst_86 = arith.constant 9.99999974E-6 : f32
      %161 = vector.broadcast %cst_86 : f32 to vector<8x1xf32>
      %162 = arith.addf %160, %161 : vector<8x1xf32>
      %163 = math.rsqrt %162 : vector<8x1xf32>
      %164 = arith.mulf %163, %28 : vector<8x1xf32>
      %165 = arith.mulf %155, %164 : vector<8x1xf32>
      %166 = arith.subf %29, %165 : vector<8x1xf32>
      %167 = vector.broadcast %164 : vector<8x1xf32> to vector<8x256xf32>
      %168 = arith.mulf %147, %167 : vector<8x256xf32>
      %169 = vector.broadcast %166 : vector<8x1xf32> to vector<8x256xf32>
      %170 = arith.addf %168, %169 : vector<8x256xf32>
      %cst_87 = arith.constant 5.000000e-01 : f32
      %171 = vector.broadcast %cst_87 : f32 to vector<8x256xf32>
      %172 = arith.mulf %171, %170 : vector<8x256xf32>
      %cst_88 = arith.constant 4.471500e-02 : f32
      %173 = vector.broadcast %cst_88 : f32 to vector<8x256xf32>
      %174 = arith.mulf %173, %170 : vector<8x256xf32>
      %175 = arith.mulf %174, %170 : vector<8x256xf32>
      %176 = arith.mulf %175, %170 : vector<8x256xf32>
      %177 = arith.addf %170, %176 : vector<8x256xf32>
      %cst_89 = arith.constant 0.797884583 : f32
      %178 = vector.broadcast %cst_89 : f32 to vector<8x256xf32>
      %179 = arith.mulf %178, %177 : vector<8x256xf32>
      %180 = math.tanh %179 : vector<8x256xf32>
      %cst_90 = arith.constant 1.000000e+00 : f32
      %181 = vector.broadcast %cst_90 : f32 to vector<8x256xf32>
      %182 = arith.addf %181, %180 : vector<8x256xf32>
      %183 = arith.mulf %172, %182 : vector<8x256xf32>
      %184 = arith.index_cast %32 : i32 to index
      %c0_91 = arith.constant 0 : index
      %c0_92 = arith.constant 0 : index
      %185 = vector.load %arg5[%184, %c0_91, %c0_92] : memref<2x8x256xf32, #tpu.memory_space<vmem>>, vector<1x8x256xf32>
      %186 = vector.shape_cast %185 : vector<1x8x256xf32> to vector<8x256xf32>
      %187 = vector.shape_cast %183 : vector<8x256xf32> to vector<1x8x256xf32>
      tpu.vector_store %arg5[%184, %c0_91, %c0_92], %187 {strides = array<i32>} : memref<2x8x256xf32, #tpu.memory_space<vmem>>, vector<1x8x256xf32>,
    }
    %c2_i32_42 = arith.constant 2 : i32
    return
  }
  func.func @transform_0(%arg0: i32) -> (i32, i32, i32) {
    %c0_i32 = arith.constant 0 : i32
    %c0_i32_0 = arith.constant 0 : i32
    %c0_i32_1 = arith.constant 0 : i32
    return %arg0, %c0_i32, %c0_i32_0 : i32, i32, i32
  }
  func.func @transform_1(%arg0: i32) -> (i32, i32, i32) {
    %c0_i32 = arith.constant 0 : i32
    %c0_i32_0 = arith.constant 0 : i32
    %c0_i32_1 = arith.constant 0 : i32
    %c0_i32_2 = arith.constant 0 : i32
    return %c0_i32, %c0_i32_0, %c0_i32_1 : i32, i32, i32
  }
  func.func @transform_2(%arg0: i32) -> (i32, i32) {
    %c0_i32 = arith.constant 0 : i32
    %c0_i32_0 = arith.constant 0 : i32
    %c0_i32_1 = arith.constant 0 : i32
    return %c0_i32, %c0_i32_0 : i32, i32
  }
  func.func @transform_3(%arg0: i32) -> (i32, i32) {
    %c0_i32 = arith.constant 0 : i32
    %c0_i32_0 = arith.constant 0 : i32
    %c0_i32_1 = arith.constant 0 : i32
    return %c0_i32, %c0_i32_0 : i32, i32
  }
  func.func @transform_4(%arg0: i32) -> (i32, i32, i32) {
    %c0_i32 = arith.constant 0 : i32
    %c0_i32_0 = arith.constant 0 : i32
    %c0_i32_1 = arith.constant 0 : i32
    return %arg0, %c0_i32, %c0_i32_0 : i32, i32, i32
  }
}

</mosaic_0001>

<bundles_post_ra>
// kernel: temporal_conv.1
= control target key start
LH: loop header
LB: loop body
LE: loop exit
PB: predicated region body
PF: predicated region fallthrough
CT: control target
= control target key end

     0   :  { %s7404_s15 = smov 0   ;;  %s7916_s0 = inlined_call_operand.vmem [shape: f32[4,8,256], index: 0, kind: input, shape index: {}]   ;;  %s7917_s1 = inlined_call_operand.vmem [shape: f32[9,8,8], index: 1, kind: input, shape index: {}]   ;;  %s7918_s2 = inlined_call_operand.vmem [shape: f32[8,9], index: 2, kind: input, shape index: {}]   ;;  %s7919_s3 = inlined_call_operand.vmem [shape: f32[3,256], index: 3, kind: input, shape index: {}]   ;;  %s7920_s4 = inlined_call_operand.vmem [shape: f32[4,8,256], index: 4, kind: output, shape index: {}]  }
   0x1 LB: > { %s7009_s16 = sadd.s32 4294967295, %s7358_s15   ;;  %p7013_p0 = scmp.ge.s32.totalorder %s7358_s15, 1  ;;  %s7358_s15 = sphi %s7404_s15, %s14_s15  }
   0x2   : > { %p164_p1 = scmp.lt.s32.totalorder %s7358_s15, 3 }
   0x4   : > { %p165_p2 = pnand %p7013_p0, %p164_p1 }
   0x5   : > { %s7014_s17 = sshll.u32 (!%p165_p2), %s7009_s16, 1  ;;  %s7487_s27 = smov (!%p165_p2), 0  }
   0x6   : > { %168 = sbr.rel (%p165_p2) target bundleno = 3072 (0xc00), region = 36  ;;  %p193_p3 = scmp.lt.s32.totalorder (!%p165_p2), %s7014_s17, 3 }
   0xb   : > { %v7415_v0 = vld [vmem:[%s7919_s3] ss:$4 sm:$0x3]  ;;  %v7425_v2 = vld [vmem:[%s7917_s1 + $0x8] sm:$0xff]  ;;  %v7435_v4 = vld [vmem:[%s7917_s1 + $0x10] sm:$0xff]  ;;  %s7922_s17 = smov (!%p193_p3, %s7014_s17), 3 }
   0xc   : > { %v7420_v1 = vld [vmem:[%s7917_s1] sm:$0xff]  ;;  %v7440_v5 = vld [vmem:[%s7917_s1 + $0x18] sm:$0xff]  ;;  %v7455_v8 = vld [vmem:[%s7917_s1 + $0x28] sm:$0xff]  ;;  %s7035_s20 = sshll.u32 %s7922_s17, 4 }
   0xd   : > { %v7430_v3 = vld [vmem:[%s7919_s3 + $0x1] ss:$4 sm:$0x3]  ;;  %v7445_v6 = vld [vmem:[%s7919_s3 + $0x2] ss:$4 sm:$0x3]  ;;  %s7480_s23 = scalar_lea.vmem %s7916_s0, %s7035_s20  ;;  %s7485_s26 = scalar_lea.vmem %s7920_s4, %s7035_s20 }
   0xe   : > { %v7450_v7 = vld [vmem:[%s7917_s1 + $0x20] sm:$0xff]  ;;  %v7460_v9 = vld [vmem:[%s7917_s1 + $0x30] sm:$0xff]  ;;  %v7465_v10 = vld [vmem:[%s7917_s1 + $0x38] sm:$0xff] }
   0xf   : > { %v7470_v11 = vld [vmem:[%s7917_s1 + $0x40] sm:$0xff] }
  0x10   : > { %v7475_v12 = vld [vmem:[%s7918_s2] sm:$0xff] }
  0x11 LB: >> { %s7037_s17 = sshll.u32 %s7362_s27, 4  ;;  %v7364_v13 = vmov 0.0   ;;  %s7365_s29 = smov 1   ;;  %v7366_v16 = vmov 0   ;;  %vm262_vm0 = vcmask 64512   ;;  %v244_v18 = vlaneseq  ;;  %s7362_s27 = sphi %s7487_s27, %s234_s27  }
  0x12   : >> { %332 = vmatprep.mubr.f32.mxu0 %v7364_v13  ;;  %418 = vmatprep.mubr.f32.mxu1 %v7364_v13  ;;  %s237_s28 = scalar_lea.vmem %s7480_s23, %s7037_s17  ;;  %v264_v17 = vsel %vm262_vm0, %v7425_v2, 0  ;;  %v732_v29 = vsel %vm262_vm0, %v7420_v1, 0  ;;  %vm7367_vm2 = vmmov 0   ;;  %s7368_s30 = smov 127  }
  0x13   : >> { %v238_v14 = vld [vmem:[%s237_s28] sm:$0xff]  ;;  %v239_v15 = vld [vmem:[%s237_s28 + $0x8] sm:$0xff]  ;;  %7322 = vset.pattern.permute.xlu1 %v7366_v16  ;;  %v7504_v19 = vand.u32 4294901760, %v264_v17  ;;  %v251_v20 = vshrl.u32 %v244_v18, 7  ;;  %v7507_v22 = vand.u32 127, %v244_v18  ;;  %v7532_v37 = vand.u32 4294901760, %v732_v29  ;;  %s6939_s10 = scalar_lea.vmem %s7485_s26, %s7037_s17 }
  0x14   : >> { %240 = vrot.lane.b32.xlu0 %v238_v14, %s7365_s29  ;;  %1201 = vperm.xlu1 %7322, %v7475_v12   ;;  %v7528_v34 = vand.u32 4294901760, %v239_v15  ;;  %v7534_v41 = vand.u32 4294901760, %v238_v14  ;;  %s7370_s5 = smov 2   ;;  %s7372_s6 = smov 124  }
  0x15   : >> { %v334_v21 = vsub.f32 %v264_v17, %v7504_v19  ;;  %v7509_v23 = vsub.s32 0, %v251_v20  ;;  %v7511_v24 = vsub.s32 1, %v251_v20  ;;  %vm246_vm1 = vcmp.lt.s32.totalorder %v7507_v22, 1  ;;  %s7373_s7 = smov 5   ;;  %s7376_s8 = smov 121  }
  0x16   : >> { %v843_v42 = vsub.f32 %v239_v15, %v7528_v34  ;;  %v802_v45 = vsub.f32 %v732_v29, %v7532_v37  ;;  %v849_v48 = vsub.f32 %v238_v14, %v7534_v41  ;;  %vm3118_vm3 = vcmp.lt.s32.totalorder %v7507_v22, 127  ;;  %s7378_s9 = smov 8   ;;  %s234_s27 = sadd.s32 1, %s7362_s27  }
  0x17   : >> { %v335_v26 = vand.u32 4294901760, %v334_v21  ;;  %v7516_v27 = vrot.slane %v7430_v3, %v7509_v23  ;;  %v7520_v28 = vrot.slane %v7430_v3, %v7511_v24  ;;  %p231_p4 = scmp.ge.s32.totalorder %s234_s27, 2  }
  0x18   : >> { %242 = vrot.lane.b32.xlu0 %v239_v15, %s7365_s29  ;;  %v803_v51 = vand.u32 4294901760, %v802_v45  ;;  %v844_v52 = vand.u32 4294901760, %v843_v42  ;;  %v850_v55 = vand.u32 4294901760, %v849_v48 }
  0x19   : >> { %v336_v31 = vsub.f32 %v334_v21, %v335_v26 }
  0x1a   : >> { %v804_v56 = vsub.f32 %v802_v45, %v803_v51  ;;  %v845_v57 = vsub.f32 %v843_v42, %v844_v52  ;;  %v851_v58 = vsub.f32 %v849_v48, %v850_v55 }
  0x1b   : >> { %v337_v40 = vand.u32 4294901760, %v336_v31 }
  0x1c   : >> { %v805_v59 = vand.u32 4294901760, %v804_v56  ;;  %v846_v60 = vand.u32 4294901760, %v845_v57  ;;  %v852_v61 = vand.u32 4294901760, %v851_v58 }
  0x86   : >> { %v241_v25 = vpop.permute.xlu0 %240 }
  0x8a   : >> { %v243_v30 = vpop.permute.xlu0 %242 }
  0x8b   : >> { %v247_v32 = vsel %vm246_vm1, %v241_v25, %v243_v30  ;;  %v248_v33 = vsel %vm246_vm1, %v243_v30, %v241_v25 }
  0x8c   : >> { %v260_v35 = vmul.f32 %v7516_v27, %v248_v33  ;;  %v261_v36 = vmul.f32 %v7520_v28, %v247_v32 }
  0x8e   : >> { %v296_v38 = vand.u32 4294901760, %v261_v36  ;;  %v298_v39 = vand.u32 4294901760, %v260_v35 }
  0x8f   : >> { %v1202_v58 = vpop.permute.xlu1 %1201 }
  0x90   : >> { %v381_v43 = vsub.f32 %v260_v35, %v298_v39  ;;  %297 = vmatprep.subr.mxu0 %v296_v38  ;;  %v375_v44 = vsub.f32 %v261_v36, %v296_v38 }
  0x91   : >> { %299 = vmatpush1.msra.mxu0 %v298_v39 }
  0x92   : >> { %338 = vmatmul.mubr.f32.vlgmr.msra.gmra.mxu0 %v337_v40  ;;  %458 = vmatprep.subr.mxu0 %v375_v44  ;;  %v376_v46 = vand.u32 4294901760, %v375_v44  ;;  %v382_v47 = vand.u32 4294901760, %v381_v43 }
  0x93   : >> { %461 = vmatpush1.msra.mxu0 %v381_v43  ;;  %494 = vmatprep.mubr.f32.mxu0 %v7364_v13 }
  0x94   : >> { %612 = vmatprep.subr.mxu0 %v376_v46  ;;  %v377_v49 = vsub.f32 %v375_v44, %v376_v46  ;;  %v383_v50 = vsub.f32 %v381_v43, %v382_v47 }
  0x96   : >> { %497 = vmatmul.mubr.f32.vlgmr.msra.gmra.mxu0 %v334_v21  ;;  %v378_v53 = vand.u32 4294901760, %v377_v49  ;;  %v384_v54 = vand.u32 4294901760, %v383_v50 }
  0x97   : >> { %616 = vmatpush1.msra.mxu0 %v382_v47  ;;  %649 = vmatprep.mubr.f32.mxu0 %v7364_v13 }
  0x98   : >> { %379 = vmatprep.subr.mxu1 %v378_v53  ;;  %765 = vmatprep.subr.mxu0 %v7528_v34 }
  0x99   : >> { %385 = vmatpush1.msra.mxu1 %v384_v54 }
  0x9a   : >> { %420 = vmatmul.mubr.f32.vlgmr.msra.gmra.mxu1 %v7504_v19  ;;  %534 = vmatprep.subr.mxu1 %v296_v38 }
  0x9b   : >> { %536 = vmatpush1.msra.mxu1 %v298_v39  ;;  %569 = vmatprep.mubr.f32.mxu1 %v7364_v13 }
  0x9c   : >> { %688 = vmatprep.subr.mxu1 %v296_v38  ;;  %651 = vmatmul.mubr.f32.vlgmr.msra.gmra.mxu0 %v7504_v19 }
  0x9d   : >> { %767 = vmatpush1.msra.mxu0 %v7534_v41  ;;  %800 = vmatprep.mubr.f32.mxu0 %v7364_v13 }
  0x9e   : >> { %573 = vmatmul.mubr.f32.vlgmr.msra.gmra.mxu1 %v335_v26  ;;  %926 = vmatprep.subr.mxu0 %v843_v42 }
  0x9f   : >> { %690 = vmatpush1.msra.mxu1 %v298_v39  ;;  %723 = vmatprep.mubr.f32.mxu1 %v7364_v13 }
  0xa0   : >> { %806 = vmatmul.mubr.f32.vlgmr.msra.gmra.mxu0 %v805_v59  ;;  %847 = vmatprep.subr.mxu1 %v846_v60 }
  0xa1   : >> { %929 = vmatpush1.msra.mxu0 %v849_v48  ;;  %962 = vmatprep.mubr.f32.mxu0 %v7364_v13 }
  0xa2   : >> { %725 = vmatmul.mubr.f32.vlgmr.msra.gmra.mxu1 %v7504_v19  ;;  %1080 = vmatprep.subr.mxu0 %v844_v52 }
  0xa3   : >> { %853 = vmatpush1.msra.mxu1 %v852_v61  ;;  %886 = vmatprep.mubr.f32.mxu1 %v7364_v13 }
  0xa4   : >> { %965 = vmatmul.mubr.f32.vlgmr.msra.gmra.mxu0 %v802_v45  ;;  %1002 = vmatprep.subr.mxu1 %v7528_v34 }
  0xa5   : >> { %1084 = vmatpush1.msra.mxu0 %v850_v55  ;;  %1117 = vmatprep.mubr.f32.mxu0 %v7364_v13 }
  0xa6   : >> { %888 = vmatmul.mubr.f32.vlgmr.msra.gmra.mxu1 %v7532_v37  ;;  %7111 = vmatprep.subr.mxu0 %v7364_v13 }
  0xa7   : >> { %1004 = vmatpush1.msra.mxu1 %v7534_v41  ;;  %1037 = vmatprep.mubr.f32.mxu1 %v7364_v13 }
  0xa8   : >> { %1119 = vmatmul.mubr.f32.vlgmr.msra.gmra.mxu0 %v7532_v37  ;;  %1156 = vmatprep.subr.mxu1 %v7528_v34 }
  0xa9   : >> { %7113 = vmatprep.mubr.msk.f32.mxu0 %vm7367_vm2, %v7364_v13 }
  0xaa   : >> { %1041 = vmatmul.mubr.f32.vlgmr.msra.gmra.mxu1 %v803_v51 }
  0xab   : >> { %1158 = vmatpush1.msra.mxu1 %v7534_v41  ;;  %1191 = vmatprep.mubr.f32.mxu1 %v7364_v13 }
  0xac   : >> { %7116 = vmatprep.subr.mxu1 %v7364_v13 }
  0xae   : >> { %1193 = vmatmul.mubr.f32.vlgmr.msra.gmra.mxu1 %v7532_v37 }
  0xaf   : >> { %7118 = vmatprep.mubr.msk.f32.mxu1 %vm7367_vm2, %v7364_v13 }
 0x152   : >> { %v339_v62 = vpop.f32.mrf.mxu0 }
 0x154   : >> { %v341_v63 = vpop.f32.mrf.mxu0 }
 0x156   : >> { %v498_v14 = vpop.f32.mrf.mxu0 }
 0x158   : >> { %v500_v15 = vpop.f32.mrf.mxu0 }
 0x15a   : >> { %v421_v17 = vpop.f32.mrf.mxu1 }
 0x15b   : >> { %v422_v18 = vadd.f32 %v421_v17, %v339_v62 }
 0x15c   : >> { %v423_v19 = vpop.f32.mrf.mxu1  ;;  %v652_v20 = vpop.f32.mrf.mxu0 }
 0x15d   : >> { %v499_v21 = vadd.f32 %v498_v14, %v422_v18  ;;  %v424_v25 = vadd.f32 %v423_v19, %v341_v63  ;;  %v7565_v63 = vrot.slane %v7415_v0, %v7509_v23  ;;  %v7569_v18 = vrot.slane %v7415_v0, %v7511_v24 }
 0x15e   : >> { %v574_v26 = vpop.f32.mrf.mxu1  ;;  %v654_v29 = vpop.f32.mrf.mxu0 }
 0x15f   : >> { %v501_v30 = vadd.f32 %v500_v15, %v424_v25  ;;  %v575_v31 = vadd.f32 %v574_v26, %v499_v21 }
 0x160   : >> { %v576_v32 = vpop.f32.mrf.mxu1  ;;  %v807_v33 = vpop.f32.mrf.mxu0 }
 0x161   : >> { %v653_v34 = vadd.f32 %v652_v20, %v575_v31  ;;  %v577_v35 = vadd.f32 %v576_v32, %v501_v30  ;;  %v1228_v31 = vsel %vm262_vm0, %v7470_v11, 0 }
 0x162   : >> { %v726_v36 = vpop.f32.mrf.mxu1  ;;  %v809_v37 = vpop.f32.mrf.mxu0  ;;  %v7591_v32 = vand.u32 4294901760, %v1228_v31 }
 0x163   : >> { %v655_v38 = vadd.f32 %v654_v29, %v577_v35  ;;  %v727_v39 = vadd.f32 %v726_v36, %v653_v34 }
 0x164   : >> { %v728_v40 = vpop.f32.mrf.mxu1  ;;  %v966_v41 = vpop.f32.mrf.mxu0 }
 0x165   : >> { %v808_v42 = vadd.f32 %v807_v33, %v727_v39  ;;  %v729_v43 = vadd.f32 %v728_v40, %v655_v38  ;;  %v7594_v33 = vsub.f32 %v1228_v31, %v7591_v32 }
 0x166   : >> { %v889_v44 = vpop.f32.mrf.mxu1  ;;  %v968_v45 = vpop.f32.mrf.mxu0 }
 0x167   : >> { %v810_v46 = vadd.f32 %v809_v37, %v729_v43  ;;  %v890_v47 = vadd.f32 %v889_v44, %v808_v42  ;;  %v7597_v34 = vand.u32 4294901760, %v7594_v33 }
 0x168   : >> { %v891_v48 = vpop.f32.mrf.mxu1  ;;  %v1120_v52 = vpop.f32.mrf.mxu0 }
 0x169   : >> { %v967_v49 = vadd.f32 %v966_v41, %v890_v47  ;;  %v892_v50 = vadd.f32 %v891_v48, %v810_v46  ;;  %v1299_v35 = vsub.f32 %v7594_v33, %v7597_v34 }
 0x16a   : >> { %v1042_v51 = vpop.f32.mrf.mxu1  ;;  %v1122_v59 = vpop.f32.mrf.mxu0 }
 0x16b   : >> { %v969_v53 = vadd.f32 %v968_v45, %v892_v50  ;;  %v1043_v54 = vadd.f32 %v1042_v51, %v967_v49  ;;  %v7601_v37 = vand.u32 4294901760, %v1299_v35 }
 0x16c   : >> { %v1044_v55 = vpop.f32.mrf.mxu1 }
 0x16d   : >> { %v1121_v56 = vadd.f32 %v1120_v52, %v1043_v54  ;;  %v1045_v57 = vadd.f32 %v1044_v55, %v969_v53 }
 0x16e   : >> { %v1194_v60 = vpop.f32.mrf.mxu1 }
 0x16f   : >> { %v1123_v61 = vadd.f32 %v1122_v59, %v1045_v57  ;;  %v1195_v62 = vadd.f32 %v1194_v60, %v1121_v56 }
 0x170   : >> { %v1196_v14 = vpop.f32.mrf.mxu1 }
 0x171   : >> { %v1204_v15 = vadd.f32 %v1202_v58, %v1195_v62  ;;  %v1197_v17 = vadd.f32 %v1196_v14, %v1123_v61 }
 0x173   : >> { %v7572_v19 = vmul.f32 %v7565_v63, %v1204_v15  ;;  %v1205_v20 = vadd.f32 %v1202_v58, %v1197_v17 }
 0x175   : >> { %v7575_v21 = vmul.f32 %v7569_v18, %v1205_v20  ;;  %v1222_v26 = vmul.f32 %v7572_v19, %v7572_v19 }
 0x177   : >> { %v1219_v25 = vadd.f32 %v7575_v21, %v7572_v19  ;;  %v1223_v29 = vmul.f32 %v7575_v21, %v7575_v21 }
 0x179   : >> { %1220 = vadd.xlane.f32.xlu1 %v1219_v25  ;;  %v1224_v30 = vadd.f32 %v1223_v29, %v1222_v26 }
 0x17b   : >> { %1225 = vadd.xlane.f32.xlu0 %v1224_v30 }
 0x191   : >> { %2128 = vrot.lane.b32.xlu0 %v7475_v12, %s7368_s30 }
 0x202   : >> { %v1221_v36 = vpop.xlane.xlu1 %1220 }
 0x203   : >> { %v1261_v38 = vand.u32 4294901760, %v1221_v36 }
 0x204   : >> { %v1226_v39 = vpop.xlane.xlu0 %1225 }
 0x205   : >> { %v1338_v40 = vsub.f32 %v1221_v36, %v1261_v38  ;;  %v1708_v41 = vand.u32 4294901760, %v1226_v39  ;;  %7112 = vmatpush3.msra.mxu0 %v1261_v38 }
 0x206   : >> { %7114 = vmatmul.mubr.f32.vlgmr.msra.gmra.mxu0 %v7601_v37  ;;  %7121 = vmatprep.subr.mxu0 %v7364_v13 }
 0x207   : >> { %v1339_v42 = vand.u32 4294901760, %v1338_v40  ;;  %7122 = vmatpush3.msra.mxu0 %v1338_v40  ;;  %7123 = vmatprep.mubr.msk.f32.mxu0 %vm7367_vm2, %v7364_v13  ;;  %v1785_v44 = vsub.f32 %v1226_v39, %v1708_v41 }
 0x208   : >> { %7131 = vmatprep.subr.mxu0 %v7364_v13 }
 0x209   : >> { %v1340_v43 = vsub.f32 %v1338_v40, %v1339_v42  ;;  %v1786_v46 = vand.u32 4294901760, %v1785_v44 }
 0x20a   : >> { %7124 = vmatmul.mubr.f32.vlgmr.msra.gmra.mxu0 %v7594_v33 }
 0x20b   : >> { %v1341_v45 = vand.u32 4294901760, %v1340_v43  ;;  %7132 = vmatpush3.msra.mxu0 %v1339_v42  ;;  %7133 = vmatprep.mubr.msk.f32.mxu0 %vm7367_vm2, %v7364_v13  ;;  %v1787_v47 = vsub.f32 %v1785_v44, %v1786_v46 }
 0x20c   : >> { %7141 = vmatprep.subr.mxu0 %v7364_v13 }
 0x20d   : >> { %7117 = vmatpush3.msra.mxu1 %v1341_v45  ;;  %v1788_v48 = vand.u32 4294901760, %v1787_v47 }
 0x20e   : >> { %7119 = vmatmul.mubr.f32.vlgmr.msra.gmra.mxu1 %v7591_v32  ;;  %7126 = vmatprep.subr.mxu1 %v7364_v13 }
 0x20f   : >> { %7134 = vmatmul.mubr.f32.vlgmr.msra.gmra.mxu0 %v7591_v32  ;;  %7127 = vmatpush3.msra.mxu1 %v1261_v38 }
 0x210   : >> { %7142 = vmatpush3.msra.mxu0 %v1708_v41  ;;  %7128 = vmatprep.mubr.msk.f32.mxu1 %vm7367_vm2, %v7364_v13 }
 0x211   : >> { %7136 = vmatprep.subr.mxu1 %v7364_v13  ;;  %7143 = vmatprep.mubr.msk.f32.mxu0 %vm7367_vm2, %v7364_v13 }
 0x212   : >> { %7151 = vmatprep.subr.mxu0 %v7364_v13  ;;  %7129 = vmatmul.mubr.f32.vlgmr.msra.gmra.mxu1 %v7597_v34 }
 0x213   : >> { %7137 = vmatpush3.msra.mxu1 %v1261_v38  ;;  %7144 = vmatmul.mubr.f32.vlgmr.msra.gmra.mxu0 %v7601_v37 }
 0x214   : >> { %7152 = vmatpush3.msra.mxu0 %v1785_v44  ;;  %7138 = vmatprep.mubr.msk.f32.mxu1 %vm7367_vm2, %v7364_v13 }
 0x215   : >> { %7146 = vmatprep.subr.mxu1 %v7364_v13  ;;  %7153 = vmatprep.mubr.msk.f32.mxu0 %vm7367_vm2, %v7364_v13 }
 0x216   : >> { %7161 = vmatprep.subr.mxu0 %v7364_v13  ;;  %7139 = vmatmul.mubr.f32.vlgmr.msra.gmra.mxu1 %v7591_v32 }
 0x217   : >> { %7147 = vmatpush3.msra.mxu1 %v1788_v48  ;;  %7154 = vmatmul.mubr.f32.vlgmr.msra.gmra.mxu0 %v7594_v33 }
 0x218   : >> { %7162 = vmatpush3.msra.mxu0 %v1786_v46  ;;  %7148 = vmatprep.mubr.msk.f32.mxu1 %vm7367_vm2, %v7364_v13 }
 0x219   : >> { %7156 = vmatprep.subr.mxu1 %v7364_v13  ;;  %7163 = vmatprep.mubr.msk.f32.mxu0 %vm7367_vm2, %v7364_v13 }
 0x21a   : >> { %7149 = vmatmul.mubr.f32.vlgmr.msra.gmra.mxu1 %v7591_v32 }
 0x21b   : >> { %7157 = vmatpush3.msra.mxu1 %v1708_v41  ;;  %7158 = vmatprep.mubr.msk.f32.mxu1 %vm7367_vm2, %v7364_v13 }
 0x21c   : >> { %7166 = vmatprep.subr.mxu1 %v7364_v13  ;;  %7164 = vmatmul.mubr.f32.vlgmr.msra.gmra.mxu0 %v7591_v32 }
 0x21d   : >> { %2247 = vmatprep.mubr.f32.mxu0 %v7364_v13 }
 0x21e   : >> { %7159 = vmatmul.mubr.f32.vlgmr.msra.gmra.mxu1 %v7597_v34 }
 0x21f   : >> { %7167 = vmatpush3.msra.mxu1 %v1708_v41  ;;  %7168 = vmatprep.mubr.msk.f32.mxu1 %vm7367_vm2, %v7364_v13 }
 0x222   : >> { %7169 = vmatmul.mubr.f32.vlgmr.msra.gmra.mxu1 %v7591_v32 }
 0x223   : >> { %2333 = vmatprep.mubr.f32.mxu1 %v7364_v13 }
 0x2c6   : >> { %v1302_v49 = vpop.f32.mrf.mxu0 }
 0x2c8   : >> { %v7115_v50 = vpop.f32.mrf.mxu0 }
 0x2ca   : >> { %v1452_v51 = vpop.f32.mrf.mxu0 }
 0x2cc   : >> { %v7125_v52 = vpop.f32.mrf.mxu0 }
 0x2cd   : >> { %v7369_v52 = vmov 2  }
 0x2ce   : >> { %v1378_v53 = vpop.f32.mrf.mxu1  ;;  %7323 = vset.pattern.permute.xlu0 %v7369_v52 }
 0x2cf   : >> { %v1379_v54 = vadd.f32 %v1378_v53, %v1302_v49  ;;  %v1600_v55 = vpop.f32.mrf.mxu0  ;;  %v2129_v53 = vpop.permute.xlu0 %2128 }
 0x2d0   : >> { %v7120_v56 = vpop.f32.mrf.mxu1 }
 0x2d1   : >> { %v1453_v57 = vadd.f32 %v1452_v51, %v1379_v54  ;;  %v7135_v58 = vpop.f32.mrf.mxu0 }
 0x2d2   : >> { %v1526_v59 = vpop.f32.mrf.mxu1 }
 0x2d3   : >> { %v1749_v60 = vpop.f32.mrf.mxu0  ;;  %v1527_v62 = vadd.f32 %v1526_v59, %v1453_v57 }
 0x2d4   : >> { %v7130_v61 = vpop.f32.mrf.mxu1 }
 0x2d5   : >> { %v7145_v14 = vpop.f32.mrf.mxu0  ;;  %v1601_v25 = vadd.f32 %v1600_v55, %v1527_v62 }
 0x2d6   : >> { %v1672_v15 = vpop.f32.mrf.mxu1 }
 0x2d7   : >> { %v1899_v17 = vpop.f32.mrf.mxu0  ;;  %v1673_v36 = vadd.f32 %v1672_v15, %v1601_v25 }
 0x2d8   : >> { %v7140_v20 = vpop.f32.mrf.mxu1 }
 0x2d9   : >> { %v7155_v26 = vpop.f32.mrf.mxu0  ;;  %v1676_v43 = vmul.f32 0.0033333334, %v1673_v36 }
 0x2da   : >> { %v1825_v29 = vpop.f32.mrf.mxu1 }
 0x2db   : >> { %v1826_v30 = vadd.f32 %v1825_v29, %v1749_v60  ;;  %v2124_v48 = vmul.f32 %v1676_v43, %v1676_v43 }
 0x2dc   : >> { %v7150_v31 = vpop.f32.mrf.mxu1  ;;  %v2047_v35 = vpop.f32.mrf.mxu0 }
 0x2dd   : >> { %v1900_v38 = vadd.f32 %v1899_v17, %v1826_v30 }
 0x2de   : >> { %v1973_v39 = vpop.f32.mrf.mxu1  ;;  %v7165_v40 = vpop.f32.mrf.mxu0 }
 0x2df   : >> { %v1974_v41 = vadd.f32 %v1973_v39, %v1900_v38  ;;  %v2179_v39 = vsel %vm262_vm0, %v7440_v5, 0 }
 0x2e0   : >> { %v7160_v42 = vpop.f32.mrf.mxu1 }
 0x2e1   : >> { %v2048_v44 = vadd.f32 %v2047_v35, %v1974_v41 }
 0x2e2   : >> { %v2119_v45 = vpop.f32.mrf.mxu1 }
 0x2e3   : >> { %v2120_v46 = vadd.f32 %v2119_v45, %v2048_v44 }
 0x2e4   : >> { %v7170_v47 = vpop.f32.mrf.mxu1 }
 0x2e5   : >> { %v2123_v49 = vmul.f32 0.0033333334, %v2120_v46 }
 0x2e7   : >> { %v2125_v50 = vsub.f32 %v2123_v49, %v2124_v48 }
 0x2e9   : >> { %v2126_v51 = vadd.f32 1e-05, %v2125_v50 }
 0x2eb   : >> { %7330 = vrsqrt.f32 %v2126_v51 }
 0x2f8   : >> { %v7331_v54 = vpop.eup %7330 }
 0x2f9   : >> { %v2131_v55 = vmul.f32 %v7331_v54, %v2129_v53 }
 0x2fb   : >> { %v2132_v56 = vmul.f32 %v2131_v55, %v1676_v43 }
 0x2fd   : >> { %2134 = vrot.lane.b32.xlu1 %v2132_v56, %s7370_s5 }
 0x301   : >> { %2140 = vperm.xlu1 %7322, %v2131_v55  }
 0x36f   : >> { %v2135_v57 = vpop.permute.xlu1 %2134 }
 0x370   : >> { %v2137_v58 = vsub.f32 %v7475_v12, %v2135_v57 }
 0x372   : >> { %2147 = vperm.xlu0 %7323, %v2137_v58  }
 0x37c   : >> { %v2141_v59 = vpop.permute.xlu1 %2140 }
 0x37d   : >> { %v2143_v60 = vmul.f32 %v2141_v59, %v7572_v19  ;;  %v2144_v61 = vmul.f32 %v2141_v59, %v7575_v21  ;;  %v2248_v19 = vand.u32 4294901760, %v2179_v39 }
 0x37f   : >> { %v2249_v21 = vsub.f32 %v2179_v39, %v2248_v19  ;;  %v7685_v39 = vrot.slane %v7445_v6, %v7509_v23 }
 0x381   : >> { %v2250_v40 = vand.u32 4294901760, %v2249_v21 }
 0x383   : >> { %v2251_v45 = vsub.f32 %v2249_v21, %v2250_v40 }
 0x385   : >> { %v2252_v51 = vand.u32 4294901760, %v2251_v45 }
 0x3ed   : >> { %v2148_v62 = vpop.permute.xlu0 %2147 }
 0x3ee   : >> { %v2150_v14 = vadd.f32 %v2148_v62, %v2143_v60  ;;  %v2151_v15 = vadd.f32 %v2148_v62, %v2144_v61  ;;  %v7371_v61 = vmov 3   ;;  %v2647_v62 = vsel %vm262_vm0, %v7435_v4, 0 }
 0x3ef   : >> { %7324 = vset.pattern.permute.xlu0 %v7371_v61 }
 0x3f0   : >> { %v2154_v17 = vmul.f32 0.044715, %v2150_v14  ;;  %v2155_v20 = vmul.f32 0.044715, %v2151_v15  ;;  %v2153_v43 = vmul.f32 0.5, %v2151_v15  ;;  %v2152_v46 = vmul.f32 0.5, %v2150_v14 }
 0x3f2   : >> { %v2156_v25 = vmul.f32 %v2154_v17, %v2150_v14  ;;  %v2157_v26 = vmul.f32 %v2155_v20, %v2151_v15 }
 0x3f4   : >> { %v2158_v29 = vmul.f32 %v2156_v25, %v2150_v14  ;;  %v2159_v30 = vmul.f32 %v2157_v26, %v2151_v15  ;;  %v3135_v25 = vsel %vm262_vm0, %v7450_v7, 0 }
 0x3f6   : >> { %v2161_v31 = vadd.f32 %v2159_v30, %v2151_v15  ;;  %v2160_v35 = vadd.f32 %v2158_v29, %v2150_v14  ;;  %v7665_v14 = vand.u32 4294901760, %v2647_v62 }
 0x3f8   : >> { %v2163_v36 = vmul.f32 0.7978846, %v2161_v31  ;;  %v2162_v38 = vmul.f32 0.7978846, %v2160_v35  ;;  %v7668_v15 = vsub.f32 %v2647_v62, %v7665_v14  ;;  %v7679_v35 = vand.u32 4294901760, %v3135_v25 }
 0x3fa   : >> { %7332 = vtanh.f32 %v2163_v36  ;;  %v2718_v20 = vand.u32 4294901760, %v7668_v15 }
 0x3fb   : >> { %7334 = vtanh.f32 %v2162_v38 }
 0x3fc   : >> { %v2719_v29 = vsub.f32 %v7668_v15, %v2718_v20 }
 0x407   : >> { %v7333_v41 = vpop.eup %7332 }
 0x408   : >> { %v7335_v42 = vpop.eup %7334  ;;  %v2167_v44 = vadd.f32 1.0, %v7333_v41 }
 0x409   : >> { %v2166_v47 = vadd.f32 1.0, %v7335_v42 }
 0x40a   : >> { %v2169_v48 = vmul.f32 %v2167_v44, %v2153_v43  ;;  %v2720_v43 = vand.u32 4294901760, %v2719_v29 }
 0x40b   : >> { %v2168_v49 = vmul.f32 %v2166_v47, %v2152_v46  ;;  %v7696_v46 = vsub.f32 %v3135_v25, %v7679_v35 }
 0x40c   : >> { %v2211_v50 = vand.u32 4294901760, %v2169_v48 }
 0x40d   : >> { %3114 = vrot.lane.b32.xlu0 %v2168_v49, %s7368_s30  ;;  %2170 = vrot.lane.b32.xlu1 %v2168_v49, %s7365_s29  ;;  %v2213_v52 = vand.u32 4294901760, %v2168_v49 }
 0x40e   : >> { %2212 = vmatprep.subr.mxu0 %v2211_v50  ;;  %v2290_v53 = vsub.f32 %v2169_v48, %v2211_v50 }
 0x40f   : >> { %2214 = vmatpush1.msra.mxu0 %v2213_v52  ;;  %v2296_v54 = vsub.f32 %v2168_v49, %v2213_v52 }
 0x410   : >> { %2253 = vmatmul.mubr.f32.vlgmr.msra.gmra.mxu0 %v2252_v51  ;;  %2373 = vmatprep.subr.mxu0 %v2290_v53  ;;  %v2291_v55 = vand.u32 4294901760, %v2290_v53 }
 0x411   : >> { %2172 = vrot.lane.b32.xlu1 %v2169_v48, %s7365_s29  ;;  %2376 = vmatpush1.msra.mxu0 %v2296_v54  ;;  %v2297_v56 = vand.u32 4294901760, %v2296_v54 }
 0x412   : >> { %2527 = vmatprep.subr.mxu0 %v2291_v55  ;;  %2409 = vmatprep.mubr.f32.mxu0 %v7364_v13  ;;  %v2292_v57 = vsub.f32 %v2290_v53, %v2291_v55  ;;  %v3206_v53 = vand.u32 4294901760, %v7696_v46 }
 0x413   : >> { %v2298_v58 = vsub.f32 %v2296_v54, %v2297_v56  ;;  %3605 = vperm.xlu0 %7324, %v7475_v12  }
 0x414   : >> { %2412 = vmatmul.mubr.f32.vlgmr.msra.gmra.mxu0 %v2249_v21  ;;  %v2293_v59 = vand.u32 4294901760, %v2292_v57  ;;  %v3207_v61 = vsub.f32 %v7696_v46, %v3206_v53 }
 0x415   : >> { %3116 = vrot.lane.b32.xlu1 %v2169_v48, %s7368_s30  ;;  %2531 = vmatpush1.msra.mxu0 %v2297_v56  ;;  %v2299_v60 = vand.u32 4294901760, %v2298_v58 }
 0x416   : >> { %2294 = vmatprep.subr.mxu1 %v2293_v59  ;;  %2564 = vmatprep.mubr.f32.mxu0 %v7364_v13 }
 0x417   : >> { %2300 = vmatpush1.msra.mxu1 %v2299_v60 }
 0x418   : >> { %2335 = vmatmul.mubr.f32.vlgmr.msra.gmra.mxu1 %v2248_v19  ;;  %2449 = vmatprep.subr.mxu1 %v2211_v50 }
 0x419   : >> { %2451 = vmatpush1.msra.mxu1 %v2213_v52  ;;  %2484 = vmatprep.mubr.f32.mxu1 %v7364_v13 }
 0x41a   : >> { %2603 = vmatprep.subr.mxu1 %v2211_v50  ;;  %2566 = vmatmul.mubr.f32.vlgmr.msra.gmra.mxu0 %v2248_v19 }
 0x41b   : >> { %2715 = vmatprep.mubr.f32.mxu0 %v7364_v13 }
 0x41c   : >> { %2488 = vmatmul.mubr.f32.vlgmr.msra.gmra.mxu1 %v2250_v40 }
 0x41d   : >> { %2605 = vmatpush1.msra.mxu1 %v2213_v52  ;;  %2638 = vmatprep.mubr.f32.mxu1 %v7364_v13 }
 0x420   : >> { %2640 = vmatmul.mubr.f32.vlgmr.msra.gmra.mxu1 %v2248_v19  ;;  %v7689_v19 = vrot.slane %v7445_v6, %v7511_v24 }
 0x421   : >> { %2801 = vmatprep.mubr.f32.mxu1 %v7364_v13 }
 0x47f   : >> { %v2171_v17 = vpop.permute.xlu1 %2170  ;;  %v3115_v21 = vpop.permute.xlu0 %3114 }
 0x483   : >> { %v2173_v26 = vpop.permute.xlu1 %2172 }
 0x484   : >> { %v2174_v30 = vsel %vm246_vm1, %v2171_v17, %v2173_v26  ;;  %v2175_v31 = vsel %vm246_vm1, %v2173_v26, %v2171_v17 }
 0x485   : >> { %v2176_v36 = vmul.f32 %v2175_v31, %v7516_v27  ;;  %v2177_v38 = vmul.f32 %v2174_v30, %v7520_v28 }
 0x487   : >> { %v2679_v40 = vand.u32 4294901760, %v2177_v38  ;;  %v2681_v41 = vand.u32 4294901760, %v2176_v36  ;;  %v3117_v42 = vpop.permute.xlu1 %3116 }
 0x488   : >> { %v3119_v44 = vsel %vm3118_vm3, %v3115_v21, %v3117_v42  ;;  %v3120_v45 = vsel %vm3118_vm3, %v3117_v42, %v3115_v21 }
 0x489   : >> { %v2764_v23 = vsub.f32 %v2176_v36, %v2681_v41  ;;  %v3132_v47 = vmul.f32 %v7685_v39, %v3119_v44  ;;  %v3133_v24 = vmul.f32 %v7689_v19, %v3120_v45  ;;  %2680 = vmatprep.subr.mxu0 %v2679_v40  ;;  %v2758_v48 = vsub.f32 %v2177_v38, %v2679_v40 }
 0x48a   : >> { %2682 = vmatpush1.msra.mxu0 %v2681_v41 }
 0x48b   : >> { %v3167_v49 = vand.u32 4294901760, %v3133_v24  ;;  %v3169_v50 = vand.u32 4294901760, %v3132_v47  ;;  %2721 = vmatmul.mubr.f32.vlgmr.msra.gmra.mxu0 %v2720_v43  ;;  %2841 = vmatprep.subr.mxu0 %v2758_v48  ;;  %v2759_v51 = vand.u32 4294901760, %v2758_v48  ;;  %v2765_v52 = vand.u32 4294901760, %v2764_v23 }
 0x48c   : >> { %2844 = vmatpush1.msra.mxu0 %v2764_v23  ;;  %2877 = vmatprep.mubr.f32.mxu0 %v7364_v13 }
 0x48d   : >> { %2995 = vmatprep.subr.mxu0 %v2759_v51  ;;  %v2760_v54 = vsub.f32 %v2758_v48, %v2759_v51  ;;  %v2766_v55 = vsub.f32 %v2764_v23, %v2765_v52  ;;  %v3246_v56 = vsub.f32 %v3133_v24, %v3167_v49  ;;  %v3252_v57 = vsub.f32 %v3132_v47, %v3169_v50 }
 0x48f   : >> { %2880 = vmatmul.mubr.f32.vlgmr.msra.gmra.mxu0 %v7668_v15  ;;  %v2761_v58 = vand.u32 4294901760, %v2760_v54  ;;  %v2767_v59 = vand.u32 4294901760, %v2766_v55  ;;  %v3247_v60 = vand.u32 4294901760, %v3246_v56  ;;  %v3253_v62 = vand.u32 4294901760, %v3252_v57 }
 0x490   : >> { %2999 = vmatpush1.msra.mxu0 %v2765_v52  ;;  %3032 = vmatprep.mubr.f32.mxu0 %v7364_v13  ;;  %v3208_v15 = vand.u32 4294901760, %v3207_v61 }
 0x491   : >> { %3168 = vmatprep.subr.mxu0 %v3167_v49  ;;  %2762 = vmatprep.subr.mxu1 %v2761_v58  ;;  %v3248_v17 = vsub.f32 %v3246_v56, %v3247_v60  ;;  %v3254_v25 = vsub.f32 %v3252_v57, %v3253_v62 }
 0x492   : >> { %2768 = vmatpush1.msra.mxu1 %v2767_v59 }
 0x493   : >> { %2803 = vmatmul.mubr.f32.vlgmr.msra.gmra.mxu1 %v7665_v14  ;;  %2917 = vmatprep.subr.mxu1 %v2679_v40  ;;  %v3249_v26 = vand.u32 4294901760, %v3248_v17  ;;  %v3255_v29 = vand.u32 4294901760, %v3254_v25 }
 0x494   : >> { %3034 = vmatmul.mubr.f32.vlgmr.msra.gmra.mxu0 %v7665_v14  ;;  %2919 = vmatpush1.msra.mxu1 %v2681_v41 }
 0x495   : >> { %3170 = vmatpush1.msra.mxu0 %v3169_v50  ;;  %3071 = vmatprep.subr.mxu1 %v2679_v40 }
 0x496   : >> { %3329 = vmatprep.subr.mxu0 %v3246_v56  ;;  %2952 = vmatprep.mubr.f32.mxu1 %v7364_v13 }
 0x497   : >> { %3203 = vmatprep.mubr.f32.mxu0 %v7364_v13  ;;  %2956 = vmatmul.mubr.f32.vlgmr.msra.gmra.mxu1 %v2718_v20 }
 0x498   : >> { %3073 = vmatpush1.msra.mxu1 %v2681_v41  ;;  %3209 = vmatmul.mubr.f32.vlgmr.msra.gmra.mxu0 %v3208_v15 }
 0x499   : >> { %3332 = vmatpush1.msra.mxu0 %v3252_v57  ;;  %3250 = vmatprep.subr.mxu1 %v3249_v26 }
 0x49a   : >> { %3483 = vmatprep.subr.mxu0 %v3247_v60  ;;  %3106 = vmatprep.mubr.f32.mxu1 %v7364_v13 }
 0x49b   : >> { %3365 = vmatprep.mubr.f32.mxu0 %v7364_v13  ;;  %3108 = vmatmul.mubr.f32.vlgmr.msra.gmra.mxu1 %v7665_v14 }
 0x49c   : >> { %3256 = vmatpush1.msra.mxu1 %v3255_v29  ;;  %3368 = vmatmul.mubr.f32.vlgmr.msra.gmra.mxu0 %v7696_v46 }
 0x49d   : >> { %3487 = vmatpush1.msra.mxu0 %v3253_v62  ;;  %3405 = vmatprep.subr.mxu1 %v3167_v49 }
 0x49e   : >> { %3289 = vmatprep.mubr.f32.mxu1 %v7364_v13  ;;  %3520 = vmatprep.mubr.f32.mxu0 %v7364_v13 }
 0x49f   : >> { %3291 = vmatmul.mubr.f32.vlgmr.msra.gmra.mxu1 %v7679_v35  ;;  %7171 = vmatprep.subr.mxu0 %v7364_v13 }
 0x4a0   : >> { %3407 = vmatpush1.msra.mxu1 %v3169_v50  ;;  %3440 = vmatprep.mubr.f32.mxu1 %v7364_v13 }
 0x4a1   : >> { %3559 = vmatprep.subr.mxu1 %v3167_v49  ;;  %3522 = vmatmul.mubr.f32.vlgmr.msra.gmra.mxu0 %v7679_v35 }
 0x4a2   : >> { %7173 = vmatprep.mubr.msk.f32.mxu0 %vm7367_vm2, %v7364_v13 }
 0x4a3   : >> { %3444 = vmatmul.mubr.f32.vlgmr.msra.gmra.mxu1 %v3206_v53 }
 0x4a4   : >> { %3561 = vmatpush1.msra.mxu1 %v3169_v50  ;;  %3594 = vmatprep.mubr.f32.mxu1 %v7364_v13 }
 0x4a5   : >> { %7176 = vmatprep.subr.mxu1 %v7364_v13 }
 0x4a7   : >> { %3596 = vmatmul.mubr.f32.vlgmr.msra.gmra.mxu1 %v7679_v35 }
 0x4a8   : >> { %7178 = vmatprep.mubr.msk.f32.mxu1 %vm7367_vm2, %v7364_v13 }
 0x4d0   : >> { %v2254_v14 = vpop.f32.mrf.mxu0 }
 0x4d2   : >> { %v2256_v20 = vpop.f32.mrf.mxu0 }
 0x4d4   : >> { %v2413_v30 = vpop.f32.mrf.mxu0 }
 0x4d6   : >> { %v2415_v36 = vpop.f32.mrf.mxu0 }
 0x4d8   : >> { %v2336_v31 = vpop.f32.mrf.mxu1 }
 0x4d9   : >> { %v2337_v21 = vadd.f32 %v2336_v31, %v2254_v14 }
 0x4da   : >> { %v2338_v38 = vpop.f32.mrf.mxu1  ;;  %v2567_v40 = vpop.f32.mrf.mxu0 }
 0x4db   : >> { %v2339_v41 = vadd.f32 %v2338_v38, %v2256_v20  ;;  %v2414_v43 = vadd.f32 %v2413_v30, %v2337_v21 }
 0x4dc   : >> { %v2489_v42 = vpop.f32.mrf.mxu1  ;;  %v2569_v44 = vpop.f32.mrf.mxu0 }
 0x4dd   : >> { %v2416_v45 = vadd.f32 %v2415_v36, %v2339_v41  ;;  %v2490_v23 = vadd.f32 %v2489_v42, %v2414_v43 }
 0x4de   : >> { %v2491_v46 = vpop.f32.mrf.mxu1 }
 0x4df   : >> { %v2492_v35 = vadd.f32 %v2491_v46, %v2416_v45  ;;  %v2568_v49 = vadd.f32 %v2567_v40, %v2490_v23 }
 0x4e0   : >> { %v2641_v24 = vpop.f32.mrf.mxu1 }
 0x4e1   : >> { %v2570_v51 = vadd.f32 %v2569_v44, %v2492_v35  ;;  %v2642_v54 = vadd.f32 %v2641_v24, %v2568_v49 }
 0x4e2   : >> { %v2643_v52 = vpop.f32.mrf.mxu1 }
 0x4e3   : >> { %v2644_v56 = vadd.f32 %v2643_v52, %v2570_v51 }
 0x54b   : >> { %v2722_v47 = vpop.f32.mrf.mxu0 }
 0x54c   : >> { %v2723_v59 = vadd.f32 %v2722_v47, %v2642_v54 }
 0x54d   : >> { %v2724_v48 = vpop.f32.mrf.mxu0 }
 0x54e   : >> { %v2725_v62 = vadd.f32 %v2724_v48, %v2644_v56 }
 0x54f   : >> { %v2881_v50 = vpop.f32.mrf.mxu0 }
 0x551   : >> { %v2883_v53 = vpop.f32.mrf.mxu0 }
 0x553   : >> { %v2804_v55 = vpop.f32.mrf.mxu1 }
 0x554   : >> { %v3035_v57 = vpop.f32.mrf.mxu0  ;;  %v2805_v17 = vadd.f32 %v2804_v55, %v2723_v59  ;;  %v3606_v59 = vpop.permute.xlu0 %3605 }
 0x555   : >> { %v2806_v58 = vpop.f32.mrf.mxu1 }
 0x556   : >> { %v3037_v60 = vpop.f32.mrf.mxu0  ;;  %v2807_v26 = vadd.f32 %v2806_v58, %v2725_v62  ;;  %v2882_v20 = vadd.f32 %v2881_v50, %v2805_v17 }
 0x557   : >> { %v2957_v61 = vpop.f32.mrf.mxu1 }
 0x558   : >> { %v3210_v15 = vpop.f32.mrf.mxu0  ;;  %v2884_v36 = vadd.f32 %v2883_v53, %v2807_v26  ;;  %v2958_v40 = vadd.f32 %v2957_v61, %v2882_v20 }
 0x559   : >> { %v2959_v25 = vpop.f32.mrf.mxu1 }
 0x55a   : >> { %v3212_v29 = vpop.f32.mrf.mxu0  ;;  %v2960_v43 = vadd.f32 %v2959_v25, %v2884_v36  ;;  %v3036_v47 = vadd.f32 %v3035_v57, %v2958_v40 }
 0x55b   : >> { %v3109_v14 = vpop.f32.mrf.mxu1 }
 0x55c   : >> { %v3369_v30 = vpop.f32.mrf.mxu0  ;;  %v3038_v49 = vadd.f32 %v3037_v60, %v2960_v43  ;;  %v3110_v53 = vadd.f32 %v3109_v14, %v3036_v47 }
 0x55d   : >> { %v3111_v31 = vpop.f32.mrf.mxu1 }
 0x55e   : >> { %v3371_v21 = vpop.f32.mrf.mxu0  ;;  %v3112_v61 = vadd.f32 %v3111_v31, %v3038_v49 }
 0x55f   : >> { %v3292_v38 = vpop.f32.mrf.mxu1 }
 0x560   : >> { %v3293_v41 = vadd.f32 %v3292_v38, %v3210_v15 }
 0x561   : >> { %v3294_v42 = vpop.f32.mrf.mxu1  ;;  %v3523_v23 = vpop.f32.mrf.mxu0 }
 0x562   : >> { %v3370_v44 = vadd.f32 %v3369_v30, %v3293_v41  ;;  %v3295_v45 = vadd.f32 %v3294_v42, %v3212_v29 }
 0x563   : >> { %v3445_v46 = vpop.f32.mrf.mxu1  ;;  %v3525_v52 = vpop.f32.mrf.mxu0 }
 0x564   : >> { %v3372_v35 = vadd.f32 %v3371_v21, %v3295_v45  ;;  %v3446_v24 = vadd.f32 %v3445_v46, %v3370_v44 }
 0x565   : >> { %v3447_v48 = vpop.f32.mrf.mxu1 }
 0x566   : >> { %v3524_v51 = vadd.f32 %v3523_v23, %v3446_v24  ;;  %v3448_v50 = vadd.f32 %v3447_v48, %v3372_v35 }
 0x567   : >> { %v3597_v54 = vpop.f32.mrf.mxu1 }
 0x568   : >> { %v3526_v55 = vadd.f32 %v3525_v52, %v3448_v50  ;;  %v3598_v56 = vadd.f32 %v3597_v54, %v3524_v51 }
 0x569   : >> { %v3599_v58 = vpop.f32.mrf.mxu1 }
 0x56a   : >> { %v3602_v62 = vadd.f32 %v3598_v56, %v3110_v53  ;;  %v3600_v17 = vadd.f32 %v3599_v58, %v3526_v55 }
 0x56c   : >> { %v3603_v15 = vadd.f32 %v3600_v17, %v3112_v61  ;;  %v3608_v25 = vadd.f32 %v3606_v59, %v3602_v62 }
 0x56e   : >> { %v3609_v26 = vadd.f32 %v3606_v59, %v3603_v15  ;;  %v7727_v57 = vmul.f32 %v3608_v25, %v7565_v63 }
 0x570   : >> { %v7730_v60 = vmul.f32 %v3609_v26, %v7569_v18  ;;  %v3615_v14 = vmul.f32 %v7727_v57, %v7727_v57 }
 0x572   : >> { %v3612_v29 = vadd.f32 %v7730_v60, %v7727_v57  ;;  %v3616_v20 = vmul.f32 %v7730_v60, %v7730_v60 }
 0x574   : >> { %3613 = vadd.xlane.f32.xlu1 %v3612_v29  ;;  %v3617_v30 = vadd.f32 %v3616_v20, %v3615_v14 }
 0x576   : >> { %3618 = vadd.xlane.f32.xlu0 %v3617_v30 }
 0x585   : >> { %4518 = vrot.lane.b32.xlu1 %v7475_v12, %s7372_s6 }
 0x5fd   : >> { %v3614_v31 = vpop.xlane.xlu1 %3613 }
 0x5fe   : >> { %v3651_v36 = vand.u32 4294901760, %v3614_v31 }
 0x5ff   : >> { %v3619_v38 = vpop.xlane.xlu0 %3618 }
 0x600   : >> { %v3728_v21 = vsub.f32 %v3614_v31, %v3651_v36  ;;  %v4098_v40 = vand.u32 4294901760, %v3619_v38  ;;  %7172 = vmatpush3.msra.mxu0 %v3651_v36 }
 0x601   : >> { %7174 = vmatmul.mubr.f32.vlgmr.msra.gmra.mxu0 %v7601_v37  ;;  %7181 = vmatprep.subr.mxu0 %v7364_v13 }
 0x602   : >> { %v3729_v41 = vand.u32 4294901760, %v3728_v21  ;;  %7182 = vmatpush3.msra.mxu0 %v3728_v21  ;;  %7183 = vmatprep.mubr.msk.f32.mxu0 %vm7367_vm2, %v7364_v13  ;;  %v4175_v43 = vsub.f32 %v3619_v38, %v4098_v40 }
 0x603   : >> { %7191 = vmatprep.subr.mxu0 %v7364_v13 }
 0x604   : >> { %v3730_v42 = vsub.f32 %v3728_v21, %v3729_v41  ;;  %v4176_v45 = vand.u32 4294901760, %v4175_v43 }
 0x605   : >> { %7184 = vmatmul.mubr.f32.vlgmr.msra.gmra.mxu0 %v7594_v33 }
 0x606   : >> { %v3731_v44 = vand.u32 4294901760, %v3730_v42  ;;  %7192 = vmatpush3.msra.mxu0 %v3729_v41  ;;  %7193 = vmatprep.mubr.msk.f32.mxu0 %vm7367_vm2, %v7364_v13  ;;  %v4177_v46 = vsub.f32 %v4175_v43, %v4176_v45 }
 0x607   : >> { %7201 = vmatprep.subr.mxu0 %v7364_v13 }
 0x608   : >> { %7177 = vmatpush3.msra.mxu1 %v3731_v44  ;;  %v4178_v23 = vand.u32 4294901760, %v4177_v46 }
 0x609   : >> { %7179 = vmatmul.mubr.f32.vlgmr.msra.gmra.mxu1 %v7591_v32  ;;  %7186 = vmatprep.subr.mxu1 %v7364_v13 }
 0x60a   : >> { %7194 = vmatmul.mubr.f32.vlgmr.msra.gmra.mxu0 %v7591_v32  ;;  %7187 = vmatpush3.msra.mxu1 %v3651_v36 }
 0x60b   : >> { %7202 = vmatpush3.msra.mxu0 %v4098_v40  ;;  %7188 = vmatprep.mubr.msk.f32.mxu1 %vm7367_vm2, %v7364_v13 }
 0x60c   : >> { %7196 = vmatprep.subr.mxu1 %v7364_v13  ;;  %7203 = vmatprep.mubr.msk.f32.mxu0 %vm7367_vm2, %v7364_v13 }
 0x60d   : >> { %7211 = vmatprep.subr.mxu0 %v7364_v13  ;;  %7189 = vmatmul.mubr.f32.vlgmr.msra.gmra.mxu1 %v7597_v34 }
 0x60e   : >> { %7197 = vmatpush3.msra.mxu1 %v3651_v36  ;;  %7204 = vmatmul.mubr.f32.vlgmr.msra.gmra.mxu0 %v7601_v37 }
 0x60f   : >> { %7212 = vmatpush3.msra.mxu0 %v4175_v43  ;;  %7198 = vmatprep.mubr.msk.f32.mxu1 %vm7367_vm2, %v7364_v13 }
 0x610   : >> { %7206 = vmatprep.subr.mxu1 %v7364_v13  ;;  %7213 = vmatprep.mubr.msk.f32.mxu0 %vm7367_vm2, %v7364_v13 }
 0x611   : >> { %7221 = vmatprep.subr.mxu0 %v7364_v13  ;;  %7199 = vmatmul.mubr.f32.vlgmr.msra.gmra.mxu1 %v7591_v32 }
 0x612   : >> { %7207 = vmatpush3.msra.mxu1 %v4178_v23  ;;  %7214 = vmatmul.mubr.f32.vlgmr.msra.gmra.mxu0 %v7594_v33 }
 0x613   : >> { %7222 = vmatpush3.msra.mxu0 %v4176_v45  ;;  %7208 = vmatprep.mubr.msk.f32.mxu1 %vm7367_vm2, %v7364_v13 }
 0x614   : >> { %7216 = vmatprep.subr.mxu1 %v7364_v13  ;;  %7223 = vmatprep.mubr.msk.f32.mxu0 %vm7367_vm2, %v7364_v13 }
 0x615   : >> { %7209 = vmatmul.mubr.f32.vlgmr.msra.gmra.mxu1 %v7591_v32 }
 0x616   : >> { %7217 = vmatpush3.msra.mxu1 %v4098_v40  ;;  %7218 = vmatprep.mubr.msk.f32.mxu1 %vm7367_vm2, %v7364_v13 }
 0x617   : >> { %7226 = vmatprep.subr.mxu1 %v7364_v13  ;;  %7224 = vmatmul.mubr.f32.vlgmr.msra.gmra.mxu0 %v7591_v32 }
 0x618   : >> { %4637 = vmatprep.mubr.f32.mxu0 %v7364_v13 }
 0x619   : >> { %7219 = vmatmul.mubr.f32.vlgmr.msra.gmra.mxu1 %v7597_v34 }
 0x61a   : >> { %7227 = vmatpush3.msra.mxu1 %v4098_v40  ;;  %7228 = vmatprep.mubr.msk.f32.mxu1 %vm7367_vm2, %v7364_v13 }
 0x61d   : >> { %7229 = vmatmul.mubr.f32.vlgmr.msra.gmra.mxu1 %v7591_v32 }
 0x61e   : >> { %4723 = vmatprep.mubr.f32.mxu1 %v7364_v13 }
 0x6c1   : >> { %v3692_v47 = vpop.f32.mrf.mxu0 }
 0x6c3   : >> { %v7175_v35 = vpop.f32.mrf.mxu0 }
 0x6c5   : >> { %v3842_v24 = vpop.f32.mrf.mxu0 }
 0x6c7   : >> { %v7185_v48 = vpop.f32.mrf.mxu0 }
 0x6c8   : >> { %v4519_v48 = vpop.permute.xlu1 %4518 }
 0x6c9   : >> { %v3768_v49 = vpop.f32.mrf.mxu1 }
 0x6ca   : >> { %v3769_v51 = vadd.f32 %v3768_v49, %v3692_v47  ;;  %v3990_v50 = vpop.f32.mrf.mxu0 }
 0x6cb   : >> { %v7180_v52 = vpop.f32.mrf.mxu1 }
 0x6cc   : >> { %v3843_v54 = vadd.f32 %v3842_v24, %v3769_v51  ;;  %v7195_v53 = vpop.f32.mrf.mxu0  ;;  %v7374_v52 = vmov 5  }
 0x6cd   : >> { %v3916_v55 = vpop.f32.mrf.mxu1 }
 0x6ce   : >> { %v4139_v56 = vpop.f32.mrf.mxu0  ;;  %v3917_v59 = vadd.f32 %v3916_v55, %v3843_v54 }
 0x6cf   : >> { %v7190_v58 = vpop.f32.mrf.mxu1 }
 0x6d0   : >> { %v7205_v61 = vpop.f32.mrf.mxu0  ;;  %v3991_v25 = vadd.f32 %v3990_v50, %v3917_v59 }
 0x6d1   : >> { %v4062_v62 = vpop.f32.mrf.mxu1 }
 0x6d2   : >> { %v4289_v17 = vpop.f32.mrf.mxu0  ;;  %v4063_v31 = vadd.f32 %v4062_v62, %v3991_v25 }
 0x6d3   : >> { %v7200_v15 = vpop.f32.mrf.mxu1 }
 0x6d4   : >> { %v7215_v26 = vpop.f32.mrf.mxu0  ;;  %v4066_v42 = vmul.f32 0.0033333334, %v4063_v31 }
 0x6d5   : >> { %v4215_v29 = vpop.f32.mrf.mxu1 }
 0x6d6   : >> { %v4216_v14 = vadd.f32 %v4215_v29, %v4139_v56  ;;  %v4514_v23 = vmul.f32 %v4066_v42, %v4066_v42 }
 0x6d7   : >> { %v7210_v20 = vpop.f32.mrf.mxu1  ;;  %v4437_v30 = vpop.f32.mrf.mxu0 }
 0x6d8   : >> { %v4290_v36 = vadd.f32 %v4289_v17, %v4216_v14 }
 0x6d9   : >> { %v4363_v38 = vpop.f32.mrf.mxu1  ;;  %v7225_v21 = vpop.f32.mrf.mxu0 }
 0x6da   : >> { %v4364_v40 = vadd.f32 %v4363_v38, %v4290_v36 }
 0x6db   : >> { %v7220_v41 = vpop.f32.mrf.mxu1 }
 0x6dc   : >> { %v4438_v43 = vadd.f32 %v4437_v30, %v4364_v40 }
 0x6dd   : >> { %v4509_v44 = vpop.f32.mrf.mxu1 }
 0x6de   : >> { %v4510_v45 = vadd.f32 %v4509_v44, %v4438_v43 }
 0x6df   : >> { %v7230_v46 = vpop.f32.mrf.mxu1 }
 0x6e0   : >> { %v4513_v47 = vmul.f32 0.0033333334, %v4510_v45 }
 0x6e2   : >> { %v4515_v35 = vsub.f32 %v4513_v47, %v4514_v23 }
 0x6e4   : >> { %v4516_v24 = vadd.f32 1e-05, %v4515_v35 }
 0x6e6   : >> { %7336 = vrsqrt.f32 %v4516_v24 }
 0x6f3   : >> { %v7337_v49 = vpop.eup %7336 }
 0x6f4   : >> { %v4521_v51 = vmul.f32 %v7337_v49, %v4519_v48 }
 0x6f6   : >> { %v4522_v50 = vmul.f32 %v4521_v51, %v4066_v42  ;;  %4530 = vperm.xlu1 %7322, %v4521_v51  }
 0x6f8   : >> { %4524 = vrot.lane.b32.xlu0 %v4522_v50, %s7373_s7 }
 0x6fa   : >> { %7325 = vset.pattern.permute.xlu1 %v7374_v52 }
 0x76a   : >> { %v4525_v54 = vpop.permute.xlu0 %4524 }
 0x76b   : >> { %v4527_v53 = vsub.f32 %v7475_v12, %v4525_v54 }
 0x76d   : >> { %4537 = vperm.xlu1 %7325, %v4527_v53  }
 0x771   : >> { %7327 = vset.pattern.permute.xlu1 %v7366_v16  ;;  %v4531_v55 = vpop.permute.xlu1 %4530  ;;  %v4569_v16 = vsel %vm262_vm0, %v7460_v9, 0 }
 0x772   : >> { %v4533_v56 = vmul.f32 %v4531_v55, %v7727_v57  ;;  %v4534_v58 = vmul.f32 %v4531_v55, %v7730_v60  ;;  %v4638_v57 = vand.u32 4294901760, %v4569_v16 }
 0x774   : >> { %v4639_v60 = vsub.f32 %v4569_v16, %v4638_v57 }
 0x776   : >> { %v4640_v38 = vand.u32 4294901760, %v4639_v60 }
 0x778   : >> { %v4641_v43 = vsub.f32 %v4639_v60, %v4640_v38 }
 0x77a   : >> { %v4642_v35 = vand.u32 4294901760, %v4641_v43 }
 0x7e8   : >> { %v4538_v59 = vpop.permute.xlu1 %4537 }
 0x7e9   : >> { %v4540_v61 = vadd.f32 %v4538_v59, %v4533_v56  ;;  %v4541_v62 = vadd.f32 %v4538_v59, %v4534_v58  ;;  %v7375_v56 = vmov 6   ;;  %v5037_v58 = vsel %vm262_vm0, %v7455_v8, 0 }
 0x7ea   : >> { %7326 = vset.pattern.permute.xlu0 %v7375_v56  ;;  %v7802_v59 = vand.u32 4294901760, %v5037_v58 }
 0x7eb   : >> { %v4544_v17 = vmul.f32 0.044715, %v4540_v61  ;;  %v4545_v15 = vmul.f32 0.044715, %v4541_v62  ;;  %v4543_v41 = vmul.f32 0.5, %v4541_v62  ;;  %v4542_v44 = vmul.f32 0.5, %v4540_v61 }
 0x7ed   : >> { %v4546_v25 = vmul.f32 %v4544_v17, %v4540_v61  ;;  %v4547_v26 = vmul.f32 %v4545_v15, %v4541_v62  ;;  %v5513_v17 = vsel %vm262_vm0, %v7465_v10, 0 }
 0x7ef   : >> { %v4548_v29 = vmul.f32 %v4546_v25, %v4540_v61  ;;  %v4549_v14 = vmul.f32 %v4547_v26, %v4541_v62 }
 0x7f1   : >> { %v4551_v20 = vadd.f32 %v4549_v14, %v4541_v62  ;;  %v4550_v30 = vadd.f32 %v4548_v29, %v4540_v61  ;;  %v5107_v61 = vsub.f32 %v5037_v58, %v7802_v59 }
 0x7f3   : >> { %v4553_v31 = vmul.f32 0.7978846, %v4551_v20  ;;  %v4552_v36 = vmul.f32 0.7978846, %v4550_v30  ;;  %v5108_v62 = vand.u32 4294901760, %v5107_v61  ;;  %v7811_v20 = vand.u32 4294901760, %v5513_v17 }
 0x7f5   : >> { %7338 = vtanh.f32 %v4553_v31  ;;  %v5109_v26 = vsub.f32 %v5107_v61, %v5108_v62 }
 0x7f6   : >> { %7340 = vtanh.f32 %v4552_v36 }
 0x802   : >> { %v7339_v21 = vpop.eup %7338 }
 0x803   : >> { %v7341_v40 = vpop.eup %7340  ;;  %v4557_v42 = vadd.f32 1.0, %v7339_v21 }
 0x804   : >> { %v4556_v45 = vadd.f32 1.0, %v7341_v40 }
 0x805   : >> { %v4559_v46 = vmul.f32 %v4557_v42, %v4543_v41  ;;  %v7820_v41 = vsub.f32 %v5513_v17, %v7811_v20 }
 0x806   : >> { %v4558_v23 = vmul.f32 %v4556_v45, %v4542_v44 }
 0x807   : >> { %4562 = vrot.lane.b32.xlu1 %v4559_v46, %s7365_s29  ;;  %v4601_v47 = vand.u32 4294901760, %v4559_v46  ;;  %v5584_v22 = vand.u32 4294901760, %v7820_v41 }
 0x808   : >> { %4560 = vrot.lane.b32.xlu0 %v4558_v23, %s7365_s29  ;;  %v4603_v24 = vand.u32 4294901760, %v4558_v23 }
 0x809   : >> { %4602 = vmatprep.subr.mxu0 %v4601_v47  ;;  %v4680_v48 = vsub.f32 %v4559_v46, %v4601_v47 }
 0x80a   : >> { %4604 = vmatpush1.msra.mxu0 %v4603_v24  ;;  %v4686_v49 = vsub.f32 %v4558_v23, %v4603_v24 }
 0x80b   : >> { %5506 = vrot.lane.b32.xlu1 %v4559_v46, %s7368_s30  ;;  %4643 = vmatmul.mubr.f32.vlgmr.msra.gmra.mxu0 %v4642_v35  ;;  %v4681_v51 = vand.u32 4294901760, %v4680_v48 }
 0x80c   : >> { %5504 = vrot.lane.b32.xlu0 %v4558_v23, %s7368_s30  ;;  %4763 = vmatprep.subr.mxu0 %v4680_v48  ;;  %v4687_v50 = vand.u32 4294901760, %v4686_v49 }
 0x80d   : >> { %4766 = vmatpush1.msra.mxu0 %v4686_v49  ;;  %4799 = vmatprep.mubr.f32.mxu0 %v7364_v13  ;;  %v4682_v52 = vsub.f32 %v4680_v48, %v4681_v51 }
 0x80e   : >> { %4917 = vmatprep.subr.mxu0 %v4681_v51  ;;  %v4688_v54 = vsub.f32 %v4686_v49, %v4687_v50  ;;  %v5585_v51 = vsub.f32 %v7820_v41, %v5584_v22 }
 0x80f   : >> { %4802 = vmatmul.mubr.f32.vlgmr.msra.gmra.mxu0 %v4639_v60  ;;  %v4683_v53 = vand.u32 4294901760, %v4682_v52 }
 0x810   : >> { %4921 = vmatpush1.msra.mxu0 %v4687_v50  ;;  %v4689_v55 = vand.u32 4294901760, %v4688_v54  ;;  %4954 = vmatprep.mubr.f32.mxu0 %v7364_v13  ;;  %v5586_v54 = vand.u32 4294901760, %v5585_v51 }
 0x811   : >> { %4684 = vmatprep.subr.mxu1 %v4683_v53  ;;  %5983 = vperm.xlu0 %7326, %v7475_v12  }
 0x812   : >> { %4690 = vmatpush1.msra.mxu1 %v4689_v55 }
 0x813   : >> { %4725 = vmatmul.mubr.f32.vlgmr.msra.gmra.mxu1 %v4638_v57  ;;  %4839 = vmatprep.subr.mxu1 %v4601_v47 }
 0x814   : >> { %4841 = vmatpush1.msra.mxu1 %v4603_v24  ;;  %4874 = vmatprep.mubr.f32.mxu1 %v7364_v13 }
 0x815   : >> { %4993 = vmatprep.subr.mxu1 %v4601_v47  ;;  %4956 = vmatmul.mubr.f32.vlgmr.msra.gmra.mxu0 %v4638_v57 }
 0x816   : >> { %5105 = vmatprep.mubr.f32.mxu0 %v7364_v13 }
 0x817   : >> { %4878 = vmatmul.mubr.f32.vlgmr.msra.gmra.mxu1 %v4640_v38  ;;  %v5110_v38 = vand.u32 4294901760, %v5109_v26 }
 0x818   : >> { %4995 = vmatpush1.msra.mxu1 %v4603_v24  ;;  %5028 = vmatprep.mubr.f32.mxu1 %v7364_v13 }
 0x81b   : >> { %5030 = vmatmul.mubr.f32.vlgmr.msra.gmra.mxu1 %v4638_v57 }
 0x81c   : >> { %5191 = vmatprep.mubr.f32.mxu1 %v7364_v13 }
 0x879   : >> { %v4563_v15 = vpop.permute.xlu1 %4562 }
 0x87a   : >> { %v4561_v25 = vpop.permute.xlu0 %4560 }
 0x87b   : >> { %v4564_v29 = vsel %vm246_vm1, %v4561_v25, %v4563_v15  ;;  %v4565_v14 = vsel %vm246_vm1, %v4563_v15, %v4561_v25 }
 0x87c   : >> { %v4566_v30 = vmul.f32 %v4565_v14, %v7516_v27  ;;  %v4567_v31 = vmul.f32 %v4564_v29, %v7520_v28 }
 0x87d   : >> { %v5507_v36 = vpop.permute.xlu1 %5506 }
 0x87e   : >> { %v5069_v16 = vand.u32 4294901760, %v4567_v31  ;;  %v5071_v57 = vand.u32 4294901760, %v4566_v30  ;;  %v5505_v60 = vpop.permute.xlu0 %5504 }
 0x87f   : >> { %v5508_v21 = vsel %vm3118_vm3, %v5505_v60, %v5507_v36  ;;  %v5509_v40 = vsel %vm3118_vm3, %v5507_v36, %v5505_v60 }
 0x880   : >> { %v5154_v42 = vsub.f32 %v4566_v30, %v5071_v57  ;;  %v5510_v43 = vmul.f32 %v5508_v21, %v7685_v39  ;;  %v5511_v27 = vmul.f32 %v5509_v40, %v7689_v19  ;;  %5070 = vmatprep.subr.mxu0 %v5069_v16  ;;  %v5148_v28 = vsub.f32 %v4567_v31, %v5069_v16 }
 0x881   : >> { %5072 = vmatpush1.msra.mxu0 %v5071_v57 }
 0x882   : >> { %v5545_v44 = vand.u32 4294901760, %v5511_v27  ;;  %v5547_v45 = vand.u32 4294901760, %v5510_v43  ;;  %5111 = vmatmul.mubr.f32.vlgmr.msra.gmra.mxu0 %v5110_v38  ;;  %5231 = vmatprep.subr.mxu0 %v5148_v28  ;;  %v5149_v46 = vand.u32 4294901760, %v5148_v28  ;;  %v5155_v23 = vand.u32 4294901760, %v5154_v42 }
 0x883   : >> { %5234 = vmatpush1.msra.mxu0 %v5154_v42  ;;  %5267 = vmatprep.mubr.f32.mxu0 %v7364_v13 }
 0x884   : >> { %5385 = vmatprep.subr.mxu0 %v5149_v46  ;;  %v5150_v47 = vsub.f32 %v5148_v28, %v5149_v46  ;;  %v5156_v35 = vsub.f32 %v5154_v42, %v5155_v23  ;;  %v5624_v39 = vsub.f32 %v5511_v27, %v5545_v44  ;;  %v5630_v24 = vsub.f32 %v5510_v43, %v5547_v45 }
 0x886   : >> { %5270 = vmatmul.mubr.f32.vlgmr.msra.gmra.mxu0 %v5107_v61  ;;  %v5151_v19 = vand.u32 4294901760, %v5150_v47  ;;  %v5157_v48 = vand.u32 4294901760, %v5156_v35  ;;  %v5625_v49 = vand.u32 4294901760, %v5624_v39  ;;  %v5631_v50 = vand.u32 4294901760, %v5630_v24 }
 0x887   : >> { %5389 = vmatpush1.msra.mxu0 %v5155_v23  ;;  %5422 = vmatprep.mubr.f32.mxu0 %v7364_v13 }
 0x888   : >> { %5546 = vmatprep.subr.mxu0 %v5545_v44  ;;  %5152 = vmatprep.subr.mxu1 %v5151_v19  ;;  %v5626_v52 = vsub.f32 %v5624_v39, %v5625_v49  ;;  %v5632_v53 = vsub.f32 %v5630_v24, %v5631_v50 }
 0x889   : >> { %5158 = vmatpush1.msra.mxu1 %v5157_v48 }
 0x88a   : >> { %5193 = vmatmul.mubr.f32.vlgmr.msra.gmra.mxu1 %v7802_v59  ;;  %5307 = vmatprep.subr.mxu1 %v5069_v16  ;;  %v5627_v55 = vand.u32 4294901760, %v5626_v52  ;;  %v5633_v56 = vand.u32 4294901760, %v5632_v53 }
 0x88b   : >> { %5424 = vmatmul.mubr.f32.vlgmr.msra.gmra.mxu0 %v7802_v59  ;;  %5309 = vmatpush1.msra.mxu1 %v5071_v57 }
 0x88c   : >> { %5548 = vmatpush1.msra.mxu0 %v5547_v45  ;;  %5461 = vmatprep.subr.mxu1 %v5069_v16 }
 0x88d   : >> { %5707 = vmatprep.subr.mxu0 %v5624_v39  ;;  %5342 = vmatprep.mubr.f32.mxu1 %v7364_v13 }
 0x88e   : >> { %5581 = vmatprep.mubr.f32.mxu0 %v7364_v13  ;;  %5346 = vmatmul.mubr.f32.vlgmr.msra.gmra.mxu1 %v5108_v62 }
 0x88f   : >> { %5463 = vmatpush1.msra.mxu1 %v5071_v57  ;;  %5587 = vmatmul.mubr.f32.vlgmr.msra.gmra.mxu0 %v5586_v54 }
 0x890   : >> { %5710 = vmatpush1.msra.mxu0 %v5630_v24  ;;  %5628 = vmatprep.subr.mxu1 %v5627_v55 }
 0x891   : >> { %5861 = vmatprep.subr.mxu0 %v5625_v49  ;;  %5496 = vmatprep.mubr.f32.mxu1 %v7364_v13 }
 0x892   : >> { %5743 = vmatprep.mubr.f32.mxu0 %v7364_v13  ;;  %5498 = vmatmul.mubr.f32.vlgmr.msra.gmra.mxu1 %v7802_v59 }
 0x893   : >> { %5634 = vmatpush1.msra.mxu1 %v5633_v56  ;;  %5746 = vmatmul.mubr.f32.vlgmr.msra.gmra.mxu0 %v7820_v41 }
 0x894   : >> { %5865 = vmatpush1.msra.mxu0 %v5631_v50  ;;  %5783 = vmatprep.subr.mxu1 %v5545_v44 }
 0x895   : >> { %5667 = vmatprep.mubr.f32.mxu1 %v7364_v13  ;;  %5898 = vmatprep.mubr.f32.mxu0 %v7364_v13 }
 0x896   : >> { %5669 = vmatmul.mubr.f32.vlgmr.msra.gmra.mxu1 %v7811_v20  ;;  %7231 = vmatprep.subr.mxu0 %v7364_v13 }
 0x897   : >> { %5785 = vmatpush1.msra.mxu1 %v5547_v45  ;;  %5818 = vmatprep.mubr.f32.mxu1 %v7364_v13 }
 0x898   : >> { %5937 = vmatprep.subr.mxu1 %v5545_v44  ;;  %5900 = vmatmul.mubr.f32.vlgmr.msra.gmra.mxu0 %v7811_v20 }
 0x899   : >> { %7233 = vmatprep.mubr.msk.f32.mxu0 %vm7367_vm2, %v7364_v13 }
 0x89a   : >> { %5822 = vmatmul.mubr.f32.vlgmr.msra.gmra.mxu1 %v5584_v22 }
 0x89b   : >> { %5939 = vmatpush1.msra.mxu1 %v5547_v45  ;;  %5972 = vmatprep.mubr.f32.mxu1 %v7364_v13 }
 0x89c   : >> { %7236 = vmatprep.subr.mxu1 %v7364_v13 }
 0x89e   : >> { %5974 = vmatmul.mubr.f32.vlgmr.msra.gmra.mxu1 %v7811_v20 }
 0x89f   : >> { %7238 = vmatprep.mubr.msk.f32.mxu1 %vm7367_vm2, %v7364_v13 }
 0x8cb   : >> { %v4644_v58 = vpop.f32.mrf.mxu0 }
 0x8cd   : >> { %v4646_v59 = vpop.f32.mrf.mxu0 }
 0x8cf   : >> { %v4803_v61 = vpop.f32.mrf.mxu0 }
 0x8d1   : >> { %v4805_v17 = vpop.f32.mrf.mxu0 }
 0x8d3   : >> { %v4726_v62 = vpop.f32.mrf.mxu1 }
 0x8d4   : >> { %v4727_v25 = vadd.f32 %v4726_v62, %v4644_v58 }
 0x8d5   : >> { %v4728_v15 = vpop.f32.mrf.mxu1  ;;  %v4957_v26 = vpop.f32.mrf.mxu0 }
 0x8d6   : >> { %v4729_v29 = vadd.f32 %v4728_v15, %v4646_v59  ;;  %v4804_v30 = vadd.f32 %v4803_v61, %v4727_v25 }
 0x8d7   : >> { %v4879_v14 = vpop.f32.mrf.mxu1  ;;  %v4959_v31 = vpop.f32.mrf.mxu0 }
 0x8d8   : >> { %v4806_v36 = vadd.f32 %v4805_v17, %v4729_v29  ;;  %v4880_v57 = vadd.f32 %v4879_v14, %v4804_v30 }
 0x8d9   : >> { %v4881_v16 = vpop.f32.mrf.mxu1 }
 0x8da   : >> { %v4882_v20 = vadd.f32 %v4881_v16, %v4806_v36  ;;  %v4958_v40 = vadd.f32 %v4957_v26, %v4880_v57 }
 0x8db   : >> { %v5031_v38 = vpop.f32.mrf.mxu1 }
 0x8dc   : >> { %v4960_v42 = vadd.f32 %v4959_v31, %v4882_v20  ;;  %v5032_v28 = vadd.f32 %v5031_v38, %v4958_v40 }
 0x8dd   : >> { %v5033_v43 = vpop.f32.mrf.mxu1 }
 0x8de   : >> { %v5034_v45 = vadd.f32 %v5033_v43, %v4960_v42  ;;  %v5984_v43 = vpop.permute.xlu0 %5983 }
 0x942   : >> { %v5112_v60 = vpop.f32.mrf.mxu0 }
 0x943   : >> { %v5113_v22 = vadd.f32 %v5112_v60, %v5032_v28 }
 0x944   : >> { %v5114_v21 = vpop.f32.mrf.mxu0 }
 0x945   : >> { %v5115_v39 = vadd.f32 %v5114_v21, %v5034_v45 }
 0x946   : >> { %v5271_v41 = vpop.f32.mrf.mxu0 }
 0x948   : >> { %v5273_v27 = vpop.f32.mrf.mxu0 }
 0x94a   : >> { %v5194_v44 = vpop.f32.mrf.mxu1 }
 0x94b   : >> { %v5425_v46 = vpop.f32.mrf.mxu0  ;;  %v5195_v24 = vadd.f32 %v5194_v44, %v5113_v22 }
 0x94c   : >> { %v5196_v23 = vpop.f32.mrf.mxu1 }
 0x94d   : >> { %v5427_v47 = vpop.f32.mrf.mxu0  ;;  %v5197_v49 = vadd.f32 %v5196_v23, %v5115_v39  ;;  %v5272_v52 = vadd.f32 %v5271_v41, %v5195_v24 }
 0x94e   : >> { %v5347_v35 = vpop.f32.mrf.mxu1 }
 0x94f   : >> { %v5588_v19 = vpop.f32.mrf.mxu0  ;;  %v5274_v55 = vadd.f32 %v5273_v27, %v5197_v49  ;;  %v5348_v59 = vadd.f32 %v5347_v35, %v5272_v52 }
 0x950   : >> { %v5349_v48 = vpop.f32.mrf.mxu1 }
 0x951   : >> { %v5590_v51 = vpop.f32.mrf.mxu0  ;;  %v5350_v17 = vadd.f32 %v5349_v48, %v5274_v55  ;;  %v5426_v14 = vadd.f32 %v5425_v46, %v5348_v59 }
 0x952   : >> { %v5499_v50 = vpop.f32.mrf.mxu1 }
 0x953   : >> { %v5747_v54 = vpop.f32.mrf.mxu0  ;;  %v5428_v16 = vadd.f32 %v5427_v47, %v5350_v17  ;;  %v5500_v21 = vadd.f32 %v5499_v50, %v5426_v14 }
 0x954   : >> { %v5501_v53 = vpop.f32.mrf.mxu1 }
 0x955   : >> { %v5749_v58 = vpop.f32.mrf.mxu0  ;;  %v5502_v27 = vadd.f32 %v5501_v53, %v5428_v16 }
 0x956   : >> { %v5670_v56 = vpop.f32.mrf.mxu1 }
 0x957   : >> { %v5671_v61 = vadd.f32 %v5670_v56, %v5588_v19 }
 0x958   : >> { %v5672_v62 = vpop.f32.mrf.mxu1  ;;  %v5901_v29 = vpop.f32.mrf.mxu0 }
 0x959   : >> { %v5748_v15 = vadd.f32 %v5747_v54, %v5671_v61  ;;  %v5673_v25 = vadd.f32 %v5672_v62, %v5590_v51 }
 0x95a   : >> { %v5823_v26 = vpop.f32.mrf.mxu1  ;;  %v5903_v20 = vpop.f32.mrf.mxu0 }
 0x95b   : >> { %v5750_v30 = vadd.f32 %v5749_v58, %v5673_v25  ;;  %v5824_v31 = vadd.f32 %v5823_v26, %v5748_v15 }
 0x95c   : >> { %v5825_v36 = vpop.f32.mrf.mxu1 }
 0x95d   : >> { %v5902_v57 = vadd.f32 %v5901_v29, %v5824_v31  ;;  %v5826_v60 = vadd.f32 %v5825_v36, %v5750_v30 }
 0x95e   : >> { %v5975_v38 = vpop.f32.mrf.mxu1 }
 0x95f   : >> { %v5904_v40 = vadd.f32 %v5903_v20, %v5826_v60  ;;  %v5976_v41 = vadd.f32 %v5975_v38, %v5902_v57 }
 0x960   : >> { %v5977_v42 = vpop.f32.mrf.mxu1 }
 0x961   : >> { %v5980_v28 = vadd.f32 %v5976_v41, %v5500_v21  ;;  %v5978_v44 = vadd.f32 %v5977_v42, %v5904_v40 }
 0x963   : >> { %v5981_v45 = vadd.f32 %v5978_v44, %v5502_v27  ;;  %v5986_v23 = vadd.f32 %v5984_v43, %v5980_v28 }
 0x965   : >> { %v5987_v22 = vadd.f32 %v5984_v43, %v5981_v45  ;;  %v7850_v46 = vmul.f32 %v5986_v23, %v7565_v63 }
 0x967   : >> { %v7853_v47 = vmul.f32 %v5987_v22, %v7569_v18  ;;  %v5993_v39 = vmul.f32 %v7850_v46, %v7850_v46 }
 0x969   : >> { %v5990_v35 = vadd.f32 %v7853_v47, %v7850_v46  ;;  %v5994_v24 = vmul.f32 %v7853_v47, %v7853_v47 }
 0x96b   : >> { %5991 = vadd.xlane.f32.xlu1 %v5990_v35  ;;  %v5995_v19 = vadd.f32 %v5994_v24, %v5993_v39 }
 0x96d   : >> { %5996 = vadd.xlane.f32.xlu0 %v5995_v19 }
 0x97c   : >> { %6896 = vrot.lane.b32.xlu1 %v7475_v12, %s7376_s8 }
 0x9f4   : >> { %v5992_v63 = vpop.xlane.xlu1 %5991 }
 0x9f5   : >> { %v6029_v48 = vand.u32 4294901760, %v5992_v63 }
 0x9f6   : >> { %v5997_v49 = vpop.xlane.xlu0 %5996 }
 0x9f7   : >> { %v6106_v18 = vsub.f32 %v5992_v63, %v6029_v48  ;;  %v6476_v51 = vand.u32 4294901760, %v5997_v49  ;;  %7232 = vmatpush3.msra.mxu0 %v6029_v48 }
 0x9f8   : >> { %7234 = vmatmul.mubr.f32.vlgmr.msra.gmra.mxu0 %v7601_v37  ;;  %7241 = vmatprep.subr.mxu0 %v7364_v13 }
 0x9f9   : >> { %v6107_v50 = vand.u32 4294901760, %v6106_v18  ;;  %7242 = vmatpush3.msra.mxu0 %v6106_v18  ;;  %7243 = vmatprep.mubr.msk.f32.mxu0 %vm7367_vm2, %v7364_v13  ;;  %v6553_v54 = vsub.f32 %v5997_v49, %v6476_v51  ;;  %v7377_v49 = vmov 8  }
 0x9fa   : >> { %7251 = vmatprep.subr.mxu0 %v7364_v13  ;;  %7329 = vset.pattern.permute.xlu0 %v7377_v49 }
 0x9fb   : >> { %v6108_v52 = vsub.f32 %v6106_v18, %v6107_v50  ;;  %v6554_v55 = vand.u32 4294901760, %v6553_v54  ;;  %v6897_v18 = vpop.permute.xlu1 %6896 }
 0x9fc   : >> { %7244 = vmatmul.mubr.f32.vlgmr.msra.gmra.mxu0 %v7594_v33 }
 0x9fd   : >> { %v6109_v53 = vand.u32 4294901760, %v6108_v52  ;;  %7252 = vmatpush3.msra.mxu0 %v6107_v50  ;;  %7253 = vmatprep.mubr.msk.f32.mxu0 %vm7367_vm2, %v7364_v13  ;;  %v6555_v56 = vsub.f32 %v6553_v54, %v6554_v55 }
 0x9fe   : >> { %7261 = vmatprep.subr.mxu0 %v7364_v13 }
 0x9ff   : >> { %7237 = vmatpush3.msra.mxu1 %v6109_v53  ;;  %v6556_v58 = vand.u32 4294901760, %v6555_v56 }
 0xa00   : >> { %7239 = vmatmul.mubr.f32.vlgmr.msra.gmra.mxu1 %v7591_v32  ;;  %7246 = vmatprep.subr.mxu1 %v7364_v13 }
 0xa01   : >> { %7254 = vmatmul.mubr.f32.vlgmr.msra.gmra.mxu0 %v7591_v32  ;;  %7247 = vmatpush3.msra.mxu1 %v6029_v48 }
 0xa02   : >> { %7262 = vmatpush3.msra.mxu0 %v6476_v51  ;;  %7248 = vmatprep.mubr.msk.f32.mxu1 %vm7367_vm2, %v7364_v13 }
 0xa03   : >> { %7256 = vmatprep.subr.mxu1 %v7364_v13  ;;  %7263 = vmatprep.mubr.msk.f32.mxu0 %vm7367_vm2, %v7364_v13 }
 0xa04   : >> { %7271 = vmatprep.subr.mxu0 %v7364_v13  ;;  %7249 = vmatmul.mubr.f32.vlgmr.msra.gmra.mxu1 %v7597_v34 }
 0xa05   : >> { %7257 = vmatpush3.msra.mxu1 %v6029_v48  ;;  %7264 = vmatmul.mubr.f32.vlgmr.msra.gmra.mxu0 %v7601_v37 }
 0xa06   : >> { %7272 = vmatpush3.msra.mxu0 %v6553_v54  ;;  %7258 = vmatprep.mubr.msk.f32.mxu1 %vm7367_vm2, %v7364_v13 }
 0xa07   : >> { %7266 = vmatprep.subr.mxu1 %v7364_v13  ;;  %7273 = vmatprep.mubr.msk.f32.mxu0 %vm7367_vm2, %v7364_v13 }
 0xa08   : >> { %7281 = vmatprep.subr.mxu0 %v7364_v13  ;;  %7259 = vmatmul.mubr.f32.vlgmr.msra.gmra.mxu1 %v7591_v32 }
 0xa09   : >> { %7267 = vmatpush3.msra.mxu1 %v6556_v58  ;;  %7274 = vmatmul.mubr.f32.vlgmr.msra.gmra.mxu0 %v7594_v33 }
 0xa0a   : >> { %7282 = vmatpush3.msra.mxu0 %v6554_v55  ;;  %7268 = vmatprep.mubr.msk.f32.mxu1 %vm7367_vm2, %v7364_v13 }
 0xa0b   : >> { %7276 = vmatprep.subr.mxu1 %v7364_v13  ;;  %7283 = vmatprep.mubr.msk.f32.mxu0 %vm7367_vm2, %v7364_v13 }
 0xa0c   : >> { %7269 = vmatmul.mubr.f32.vlgmr.msra.gmra.mxu1 %v7591_v32 }
 0xa0d   : >> { %7277 = vmatpush3.msra.mxu1 %v6476_v51  ;;  %7278 = vmatprep.mubr.msk.f32.mxu1 %vm7367_vm2, %v7364_v13 }
 0xa0e   : >> { %7286 = vmatprep.subr.mxu1 %v7364_v13  ;;  %7284 = vmatmul.mubr.f32.vlgmr.msra.gmra.mxu0 %v7591_v32 }
 0xa10   : >> { %7279 = vmatmul.mubr.f32.vlgmr.msra.gmra.mxu1 %v7597_v34 }
 0xa11   : >> { %7287 = vmatpush3.msra.mxu1 %v6476_v51  ;;  %7288 = vmatprep.mubr.msk.f32.mxu1 %vm7367_vm2, %v7364_v13 }
 0xa14   : >> { %7289 = vmatmul.mubr.f32.vlgmr.msra.gmra.mxu1 %v7591_v32 }
 0xab8   : >> { %v6070_v33 = vpop.f32.mrf.mxu0 }
 0xaba   : >> { %v7235_v37 = vpop.f32.mrf.mxu0 }
 0xabc   : >> { %v6220_v59 = vpop.f32.mrf.mxu0 }
 0xabe   : >> { %v7245_v61 = vpop.f32.mrf.mxu0 }
 0xac0   : >> { %v6146_v62 = vpop.f32.mrf.mxu1 }
 0xac1   : >> { %v6147_v17 = vadd.f32 %v6146_v62, %v6070_v33  ;;  %v6368_v15 = vpop.f32.mrf.mxu0 }
 0xac2   : >> { %v7240_v25 = vpop.f32.mrf.mxu1 }
 0xac3   : >> { %v6221_v26 = vadd.f32 %v6220_v59, %v6147_v17  ;;  %v7255_v29 = vpop.f32.mrf.mxu0 }
 0xac4   : >> { %v6294_v14 = vpop.f32.mrf.mxu1 }
 0xac5   : >> { %v6517_v30 = vpop.f32.mrf.mxu0  ;;  %v6295_v34 = vadd.f32 %v6294_v14, %v6221_v26 }
 0xac6   : >> { %v7250_v31 = vpop.f32.mrf.mxu1 }
 0xac7   : >> { %v7265_v36 = vpop.f32.mrf.mxu0  ;;  %v6369_v60 = vadd.f32 %v6368_v15, %v6295_v34 }
 0xac8   : >> { %v6440_v16 = vpop.f32.mrf.mxu1 }
 0xac9   : >> { %v6667_v57 = vpop.f32.mrf.mxu0  ;;  %v6441_v41 = vadd.f32 %v6440_v16, %v6369_v60 }
 0xaca   : >> { %v7260_v13 = vpop.f32.mrf.mxu1 }
 0xacb   : >> { %v7275_v32 = vpop.f32.mrf.mxu0  ;;  %v6444_v45 = vmul.f32 0.0033333334, %v6441_v41 }
 0xacc   : >> { %v6593_v20 = vpop.f32.mrf.mxu1 }
 0xacd   : >> { %v6594_v38 = vadd.f32 %v6593_v20, %v6517_v30  ;;  %v6892_v24 = vmul.f32 %v6444_v45, %v6444_v45 }
 0xace   : >> { %v7270_v21 = vpop.f32.mrf.mxu1  ;;  %v6815_v40 = vpop.f32.mrf.mxu0 }
 0xacf   : >> { %v6668_v42 = vadd.f32 %v6667_v57, %v6594_v38 }
 0xad0   : >> { %v6741_v43 = vpop.f32.mrf.mxu1  ;;  %v7285_v27 = vpop.f32.mrf.mxu0 }
 0xad1   : >> { %v6742_v28 = vadd.f32 %v6741_v43, %v6668_v42 }
 0xad2   : >> { %v7280_v44 = vpop.f32.mrf.mxu1 }
 0xad3   : >> { %v6816_v23 = vadd.f32 %v6815_v40, %v6742_v28 }
 0xad4   : >> { %v6887_v22 = vpop.f32.mrf.mxu1 }
 0xad5   : >> { %v6888_v35 = vadd.f32 %v6887_v22, %v6816_v23 }
 0xad6   : >> { %v7290_v39 = vpop.f32.mrf.mxu1 }
 0xad7   : >> { %v6891_v19 = vmul.f32 0.0033333334, %v6888_v35 }
 0xad9   : >> { %v6893_v63 = vsub.f32 %v6891_v19, %v6892_v24 }
 0xadb   : >> { %v6894_v48 = vadd.f32 1e-05, %v6893_v63 }
 0xadd   : >> { %7342 = vrsqrt.f32 %v6894_v48 }
 0xaea   : >> { %v7343_v51 = vpop.eup %7342 }
 0xaeb   : >> { %v6899_v50 = vmul.f32 %v7343_v51, %v6897_v18 }
 0xaed   : >> { %v6900_v52 = vmul.f32 %v6899_v50, %v6444_v45  ;;  %6908 = vperm.xlu1 %7327, %v6899_v50  }
 0xaef   : >> { %6902 = vrot.lane.b32.xlu0 %v6900_v52, %s7378_s9 }
 0xaf1   : >> { %7328 = vset.pattern.permute.xlu1 %v7377_v49 }
 0xb61   : >> { %v6903_v54 = vpop.permute.xlu0 %6902 }
 0xb62   : >> { %v6905_v53 = vsub.f32 %v7475_v12, %v6903_v54 }
 0xb64   : >> { %6915 = vperm.xlu1 %7328, %v6905_v53  }
 0xb68   : >> { %v6909_v55 = vpop.permute.xlu1 %6908 }
 0xb69   : >> { %v6911_v56 = vmul.f32 %v6909_v55, %v7850_v46  ;;  %v6912_v58 = vmul.f32 %v6909_v55, %v7853_v47 }
 0xbdf   : >> { %v6916_v33 = vpop.permute.xlu1 %6915 }
 0xbe0   : >> { %v6918_v37 = vadd.f32 %v6916_v33, %v6911_v56  ;;  %v6919_v59 = vadd.f32 %v6916_v33, %v6912_v58 }
 0xbe2   : >> { %v6922_v61 = vmul.f32 0.044715, %v6918_v37  ;;  %v6923_v62 = vmul.f32 0.044715, %v6919_v59  ;;  %v6920_v47 = vmul.f32 0.5, %v6918_v37  ;;  %v6921_v16 = vmul.f32 0.5, %v6919_v59 }
 0xbe4   : >> { %v6924_v17 = vmul.f32 %v6922_v61, %v6918_v37  ;;  %v6925_v15 = vmul.f32 %v6923_v62, %v6919_v59 }
 0xbe6   : >> { %v6926_v25 = vmul.f32 %v6924_v17, %v6918_v37  ;;  %v6927_v26 = vmul.f32 %v6925_v15, %v6919_v59 }
 0xbe8   : >> { %v6928_v29 = vadd.f32 %v6926_v25, %v6918_v37  ;;  %v6929_v14 = vadd.f32 %v6927_v26, %v6919_v59 }
 0xbea   : >> { %v6930_v30 = vmul.f32 0.7978846, %v6928_v29  ;;  %v6931_v31 = vmul.f32 0.7978846, %v6929_v14 }
 0xbec   : >> { %7344 = vtanh.f32 %v6930_v30 }
 0xbed   : >> { %7346 = vtanh.f32 %v6931_v31 }
 0xbf9   : >> { %v7345_v46 = vpop.eup %7344 }
 0xbfa   : >> { %v7347_v34 = vpop.eup %7346  ;;  %v6934_v36 = vadd.f32 1.0, %v7345_v46 }
 0xbfb   : >> { %v6935_v57 = vadd.f32 1.0, %v7347_v34  ;;  %233 = sbr.rel (!%p231_p4) target bundleno = 17 (0x11), region = 85 }
 0xbfc   : >> { %v6936_v13 = vmul.f32 %v6934_v36, %v6920_v47 }
 0xbfd   : >> { %v6937_v60 = vmul.f32 %v6935_v57, %v6921_v16 }
 0xbfe   : >> { %6940 = vst [vmem:[%s6939_s10] sm:$0xff] %v6936_v13 }
 0xbff   : >> { %6941 = vst [vmem:[%s6939_s10 + $0x8] sm:$0xff] %v6937_v60 }
 0xc00 PF: > { %s14_s15 = sadd.s32 1, %s7358_s15  }
 0xc01   : > { %p11_p5 = scmp.ge.s32.totalorder %s14_s15, 4  }
 0xc03   :  { %13 = sbr.rel (!%p11_p5) target bundleno = 1 (0x1), region = 96 }

</bundles_post_ra>
